<compile_context>
chip_gen: v5e
topology: v5e:2x2
jax: 0.10.0
libtpu: 0.0.40
codegen_flags: <defaults>
</compile_context>

<pallas_src>
import math

import jax
import jax.numpy as jnp
from jax.experimental import pallas as pl
from jax.experimental.pallas import tpu as pltpu

f32 = jnp.float32
bf16 = jnp.bfloat16

_CP = pltpu.CompilerParams(dimension_semantics=("parallel",))


# ----------------------------------------------------------------------------
# BlockSpec helpers
# ----------------------------------------------------------------------------
def _bspec(shape):
    """Per-sample block over the batch axis (squeezed), grid=(B,)."""
    n = len(shape)

    def idx(b):
        return (b,) + (0,) * (n - 1)

    return pl.BlockSpec((None,) + tuple(shape[1:]), idx)


def _wspec(a):
    """Whole-array block, broadcast across the batch grid."""
    n = a.ndim

    def idx(b):
        return (0,) * n

    return pl.BlockSpec(tuple(a.shape), idx)


# ----------------------------------------------------------------------------
# Kernel A: Residual(Conv2d_BN depthwise KxK)  -- VPU path, f32
#   out = x + scale * dwconv(x) + shift
# ----------------------------------------------------------------------------
def _res_dw_kernel(x_ref, w_ref, s_ref, b_ref, o_ref, scr):
    H, W, C = x_ref.shape
    K = w_ref.shape[0]
    p = K // 2

    @pl.when(pl.program_id(0) == 0)
    def _():
        scr[...] = jnp.zeros(scr.shape, scr.dtype)   # halo ring stays zero

    x = x_ref[...]
    scr[p:p + H, p:p + W, :] = x
    w = w_ref[...]                                   # (K, K, C), tiny

    acc = jnp.zeros((H, W, C), f32)
    for dy in range(K):
        for dx in range(K):
            acc = acc + scr[dy:dy + H, dx:dx + W, :] * w[dy, dx].reshape(1, 1, C)
    o_ref[...] = x + acc * s_ref[...] + b_ref[...]


# ----------------------------------------------------------------------------
# Kernel B: Residual(Conv2d_BN dense KxK, groups=1)  -- MXU path, bf16 -> f32
#   out = x + scale * conv(x) + shift
# ----------------------------------------------------------------------------
def _res_dense_kernel(x_ref, w_ref, s_ref, b_ref, o_ref, scr):
    H, W, Cin = x_ref.shape
    K, _, _, Cout = w_ref.shape
    p = K // 2

    @pl.when(pl.program_id(0) == 0)
    def _():
        scr[...] = jnp.zeros(scr.shape, scr.dtype)   # halo ring stays zero

    x = x_ref[...]
    scr[p:p + H, p:p + W, :] = x.astype(scr.dtype)   # single f32->bf16 cast

    acc = jnp.zeros((H * W, Cout), f32)
    for dy in range(K):
        for dx in range(K):
            patch = scr[dy:dy + H, dx:dx + W, :]
            acc = acc + jnp.dot(patch.reshape(H * W, Cin), w_ref[dy, dx],
                                preferred_element_type=f32)
    y = acc * s_ref[...] + b_ref[...]
    o_ref[...] = x + y.reshape(H, W, Cout)


# ----------------------------------------------------------------------------
# Wrapper: Residual(Conv2d_BN(C, C, K, stride=1, pad=K//2, groups)) eval fwd
# ----------------------------------------------------------------------------
def residual_conv2d_bn(x_nchw, w_oihw, gamma, beta, mean, var, *, groups, eps=1e-5):
    B, C, H, W = x_nchw.shape
    Cout, _, K, _ = w_oihw.shape
    assert Cout == C, "Residual requires m(x) to match x's channel count"
    p = K // 2

    x = jnp.transpose(x_nchw, (0, 2, 3, 1)).astype(f32)            # NHWC
    scale = (gamma / jnp.sqrt(var + eps)).astype(f32)
    shift = (beta - mean * scale).astype(f32)

    if groups == C:                                                 # depthwise
        w = jnp.transpose(w_oihw[:, 0], (1, 2, 0)).astype(f32)      # (K,K,C)
        kernel = _res_dw_kernel
        s, b = scale.reshape(1, 1, C), shift.reshape(1, 1, C)
        scr = pltpu.VMEM((H + 2 * p, W + 2 * p, C), f32)
    elif groups == 1:                                               # dense
        w = jnp.transpose(w_oihw, (2, 3, 1, 0)).astype(bf16)        # (K,K,Cin,Cout)
        kernel = _res_dense_kernel
        s, b = scale.reshape(1, C), shift.reshape(1, C)
        scr = pltpu.VMEM((H + 2 * p, W + 2 * p, C), bf16)
    else:
        raise NotImplementedError("groups must be 1 or in_channels")

    args = [x, w, s, b]
    out = pl.pallas_call(
        kernel,
        out_shape=jax.ShapeDtypeStruct((B, H, W, C), f32),
        grid=(B,),
        in_specs=[_bspec(x.shape)] + [_wspec(a) for a in args[1:]],
        out_specs=_bspec((B, H, W, C)),
        scratch_shapes=[scr],
        compiler_params=_CP,
    )(*args)
    return jnp.transpose(out, (0, 3, 1, 2))                         # back to NCHW


# ----------------------------------------------------------------------------
# Pure-JAX reference (eval-mode BN)
# ----------------------------------------------------------------------------
def _bn_eval(y, gamma, beta, mean, var, eps):
    scale = gamma / jnp.sqrt(var + eps)
    shift = beta - mean * scale
    return y * scale[None, :, None, None] + shift[None, :, None, None]


def ref_residual(x, w, gamma, beta, mean, var, *, groups, eps=1e-5, matmul_bf16=False):
    lhs, rhs = (x.astype(bf16), w.astype(bf16)) if matmul_bf16 else (x, w)
    pad = w.shape[2] // 2
    y = jax.lax.conv_general_dilated(
        lhs, rhs, window_strides=(1, 1), padding=[(pad, pad), (pad, pad)],
        feature_group_count=groups,
        dimension_numbers=("NCHW", "OIHW", "NCHW"),
        preferred_element_type=f32,
        precision=jax.lax.Precision.HIGHEST)
    return x + _bn_eval(y, gamma, beta, mean, var, eps)


# ----------------------------------------------------------------------------
if __name__ == "__main__":
    B, C, H, W, K = 2, 32, 16, 16, 3
    key = jax.random.PRNGKey(0)
    kx, kwd, kwf, kg, kb, km, kv = jax.random.split(key, 7)

    x = jax.random.normal(kx, (B, C, H, W), f32)
    gamma = 1.0 + 0.1 * jax.random.normal(kg, (C,), f32)
    beta = 0.1 * jax.random.normal(kb, (C,), f32)
    mean = 0.1 * jax.random.normal(km, (C,), f32)
    var = 1.0 + 0.1 * jnp.abs(jax.random.normal(kv, (C,), f32))

    fwd = jax.jit(residual_conv2d_bn, static_argnames=("groups",))

    # Case 1: Residual(Conv2d_BN(C, C, 3, 1, 1, groups=C))  -- depthwise branch
    w_dw = jax.random.normal(kwd, (C, 1, K, K), f32) / math.sqrt(K * K)
    out_dw = jax.block_until_ready(fwd(x, w_dw, gamma, beta, mean, var, groups=C))
    ref_dw = ref_residual(x, w_dw, gamma, beta, mean, var, groups=C)
    assert out_dw.shape == (B, C, H, W), out_dw.shape
    assert bool(jnp.all(jnp.isfinite(out_dw)))
    err_dw = float(jnp.max(jnp.abs(out_dw - ref_dw)))
    assert err_dw < 1e-3, err_dw

    # Case 2: Residual(Conv2d_BN(C, C, 3, 1, 1))            -- dense conv branch
    w_ds = jax.random.normal(kwf, (C, C, K, K), f32) / math.sqrt(C * K * K)
    out_ds = jax.block_until_ready(fwd(x, w_ds, gamma, beta, mean, var, groups=1))
    ref_ds = ref_residual(x, w_ds, gamma, beta, mean, var, groups=1, matmul_bf16=True)
    assert out_ds.shape == (B, C, H, W), out_ds.shape
    assert bool(jnp.all(jnp.isfinite(out_ds)))
    err_ds = float(jnp.max(jnp.abs(out_ds - ref_ds)))
    assert err_ds < 2e-2, err_ds

    print("KERNEL_OK")
</pallas_src>

<mosaic_0001>
module attributes {stable_mosaic.version = 11 : i64} {
  func.func @_res_dw_kernel(%arg0: i32, %arg1: memref<1x16x16x32xf32, #tpu.memory_space<vmem>>, %arg2: memref<3x3x32xf32, #tpu.memory_space<vmem>>, %arg3: memref<1x1x32xf32, #tpu.memory_space<vmem>>, %arg4: memref<1x1x32xf32, #tpu.memory_space<vmem>>, %arg5: memref<1x16x16x32xf32, #tpu.memory_space<vmem>>, %arg6: memref<18x18x32xf32, #tpu.memory_space<vmem>>) attributes {dimension_semantics = [#tpu.dimension_semantics<parallel>], iteration_bounds = array<i64: 2>, scalar_prefetch = 0 : i64, scratch_operands = 1 : i64, tpu.core_type = #tpu.core_type<tc>, window_params = [{transform_indices = @transform_0, window_bounds = array<i64: 1, 16, 16, 32>}, {pipeline_mode = #tpu.pipeline_mode<synchronous>, transform_indices = @transform_1, window_bounds = array<i64: 3, 3, 32>}, {pipeline_mode = #tpu.pipeline_mode<synchronous>, transform_indices = @transform_2, window_bounds = array<i64: 1, 1, 32>}, {pipeline_mode = #tpu.pipeline_mode<synchronous>, transform_indices = @transform_3, window_bounds = array<i64: 1, 1, 32>}, {transform_indices = @transform_4, window_bounds = array<i64: 1, 16, 16, 32>}]} {
    %c0_i32 = arith.constant 0 : i32
    %0 = arith.cmpi eq, %arg0, %c0_i32 : i32
    %1 = arith.extui %0 : i1 to i32
    %c0_i32_0 = arith.constant 0 : i32
    %2 = arith.cmpi ne, %1, %c0_i32_0 : i32
    scf.if %2 {
      %cst_45 = arith.constant 0.000000e+00 : f32
      %81 = vector.broadcast %cst_45 : f32 to vector<18x18x32xf32>
      %c0_46 = arith.constant 0 : index
      %c0_47 = arith.constant 0 : index
      %c0_48 = arith.constant 0 : index
      %82 = vector.load %arg6[%c0_46, %c0_47, %c0_48] : memref<18x18x32xf32, #tpu.memory_space<vmem>>, vector<18x18x32xf32>
      tpu.vector_store %arg6[%c0_46, %c0_47, %c0_48], %81 {strides = array<i32>} : memref<18x18x32xf32, #tpu.memory_space<vmem>>, vector<18x18x32xf32>,
    } else {
    }
    %c0 = arith.constant 0 : index
    %c0_1 = arith.constant 0 : index
    %c0_2 = arith.constant 0 : index
    %c0_3 = arith.constant 0 : index
    %3 = vector.load %arg1[%c0, %c0_1, %c0_2, %c0_3] : memref<1x16x16x32xf32, #tpu.memory_space<vmem>>, vector<1x16x16x32xf32>
    %4 = vector.shape_cast %3 : vector<1x16x16x32xf32> to vector<16x16x32xf32>
    %c1 = arith.constant 1 : index
    %c1_4 = arith.constant 1 : index
    %c0_5 = arith.constant 0 : index
    %5 = vector.load %arg6[%c1, %c1_4, %c0_5] : memref<18x18x32xf32, #tpu.memory_space<vmem>>, vector<16x16x32xf32>
    tpu.vector_store %arg6[%c1, %c1_4, %c0_5], %4 {strides = array<i32>} : memref<18x18x32xf32, #tpu.memory_space<vmem>>, vector<16x16x32xf32>,
    %c0_6 = arith.constant 0 : index
    %c0_7 = arith.constant 0 : index
    %c0_8 = arith.constant 0 : index
    %6 = vector.load %arg2[%c0_6, %c0_7, %c0_8] : memref<3x3x32xf32, #tpu.memory_space<vmem>>, vector<3x3x32xf32>
    %cst = arith.constant 0.000000e+00 : f32
    %7 = vector.broadcast %cst : f32 to vector<16x16x32xf32>
    %c0_9 = arith.constant 0 : index
    %c0_10 = arith.constant 0 : index
    %c0_11 = arith.constant 0 : index
    %8 = vector.load %arg6[%c0_9, %c0_10, %c0_11] : memref<18x18x32xf32, #tpu.memory_space<vmem>>, vector<16x16x32xf32>
    %9 = vector.extract_strided_slice %6 {offsets = [0, 0, 0], sizes = [1, 1, 32], strides = [1, 1, 1]} : vector<3x3x32xf32> to vector<1x1x32xf32>
    %10 = vector.shape_cast %9 : vector<1x1x32xf32> to vector<32xf32>
    %11 = vector.shape_cast %10 : vector<32xf32> to vector<1x1x32xf32>
    %12 = vector.broadcast %11 : vector<1x1x32xf32> to vector<16x16x32xf32>
    %13 = arith.mulf %8, %12 : vector<16x16x32xf32>
    %14 = arith.addf %7, %13 : vector<16x16x32xf32>
    %c0_12 = arith.constant 0 : index
    %c1_13 = arith.constant 1 : index
    %c0_14 = arith.constant 0 : index
    %15 = vector.load %arg6[%c0_12, %c1_13, %c0_14] : memref<18x18x32xf32, #tpu.memory_space<vmem>>, vector<16x16x32xf32>
    %16 = vector.extract_strided_slice %6 {offsets = [0, 1, 0], sizes = [1, 1, 32], strides = [1, 1, 1]} : vector<3x3x32xf32> to vector<1x1x32xf32>
    %17 = vector.shape_cast %16 : vector<1x1x32xf32> to vector<32xf32>
    %18 = vector.shape_cast %17 : vector<32xf32> to vector<1x1x32xf32>
    %19 = vector.broadcast %18 : vector<1x1x32xf32> to vector<16x16x32xf32>
    %20 = arith.mulf %15, %19 : vector<16x16x32xf32>
    %21 = arith.addf %14, %20 : vector<16x16x32xf32>
    %c0_15 = arith.constant 0 : index
    %c2 = arith.constant 2 : index
    %c0_16 = arith.constant 0 : index
    %22 = vector.load %arg6[%c0_15, %c2, %c0_16] : memref<18x18x32xf32, #tpu.memory_space<vmem>>, vector<16x16x32xf32>
    %23 = vector.extract_strided_slice %6 {offsets = [0, 2, 0], sizes = [1, 1, 32], strides = [1, 1, 1]} : vector<3x3x32xf32> to vector<1x1x32xf32>
    %24 = vector.shape_cast %23 : vector<1x1x32xf32> to vector<32xf32>
    %25 = vector.shape_cast %24 : vector<32xf32> to vector<1x1x32xf32>
    %26 = vector.broadcast %25 : vector<1x1x32xf32> to vector<16x16x32xf32>
    %27 = arith.mulf %22, %26 : vector<16x16x32xf32>
    %28 = arith.addf %21, %27 : vector<16x16x32xf32>
    %c1_17 = arith.constant 1 : index
    %c0_18 = arith.constant 0 : index
    %c0_19 = arith.constant 0 : index
    %29 = vector.load %arg6[%c1_17, %c0_18, %c0_19] : memref<18x18x32xf32, #tpu.memory_space<vmem>>, vector<16x16x32xf32>
    %30 = vector.extract_strided_slice %6 {offsets = [1, 0, 0], sizes = [1, 1, 32], strides = [1, 1, 1]} : vector<3x3x32xf32> to vector<1x1x32xf32>
    %31 = vector.shape_cast %30 : vector<1x1x32xf32> to vector<32xf32>
    %32 = vector.shape_cast %31 : vector<32xf32> to vector<1x1x32xf32>
    %33 = vector.broadcast %32 : vector<1x1x32xf32> to vector<16x16x32xf32>
    %34 = arith.mulf %29, %33 : vector<16x16x32xf32>
    %35 = arith.addf %28, %34 : vector<16x16x32xf32>
    %c1_20 = arith.constant 1 : index
    %c1_21 = arith.constant 1 : index
    %c0_22 = arith.constant 0 : index
    %36 = vector.load %arg6[%c1_20, %c1_21, %c0_22] : memref<18x18x32xf32, #tpu.memory_space<vmem>>, vector<16x16x32xf32>
    %37 = vector.extract_strided_slice %6 {offsets = [1, 1, 0], sizes = [1, 1, 32], strides = [1, 1, 1]} : vector<3x3x32xf32> to vector<1x1x32xf32>
    %38 = vector.shape_cast %37 : vector<1x1x32xf32> to vector<32xf32>
    %39 = vector.shape_cast %38 : vector<32xf32> to vector<1x1x32xf32>
    %40 = vector.broadcast %39 : vector<1x1x32xf32> to vector<16x16x32xf32>
    %41 = arith.mulf %36, %40 : vector<16x16x32xf32>
    %42 = arith.addf %35, %41 : vector<16x16x32xf32>
    %c1_23 = arith.constant 1 : index
    %c2_24 = arith.constant 2 : index
    %c0_25 = arith.constant 0 : index
    %43 = vector.load %arg6[%c1_23, %c2_24, %c0_25] : memref<18x18x32xf32, #tpu.memory_space<vmem>>, vector<16x16x32xf32>
    %44 = vector.extract_strided_slice %6 {offsets = [1, 2, 0], sizes = [1, 1, 32], strides = [1, 1, 1]} : vector<3x3x32xf32> to vector<1x1x32xf32>
    %45 = vector.shape_cast %44 : vector<1x1x32xf32> to vector<32xf32>
    %46 = vector.shape_cast %45 : vector<32xf32> to vector<1x1x32xf32>
    %47 = vector.broadcast %46 : vector<1x1x32xf32> to vector<16x16x32xf32>
    %48 = arith.mulf %43, %47 : vector<16x16x32xf32>
    %49 = arith.addf %42, %48 : vector<16x16x32xf32>
    %c2_26 = arith.constant 2 : index
    %c0_27 = arith.constant 0 : index
    %c0_28 = arith.constant 0 : index
    %50 = vector.load %arg6[%c2_26, %c0_27, %c0_28] : memref<18x18x32xf32, #tpu.memory_space<vmem>>, vector<16x16x32xf32>
    %51 = vector.extract_strided_slice %6 {offsets = [2, 0, 0], sizes = [1, 1, 32], strides = [1, 1, 1]} : vector<3x3x32xf32> to vector<1x1x32xf32>
    %52 = vector.shape_cast %51 : vector<1x1x32xf32> to vector<32xf32>
    %53 = vector.shape_cast %52 : vector<32xf32> to vector<1x1x32xf32>
    %54 = vector.broadcast %53 : vector<1x1x32xf32> to vector<16x16x32xf32>
    %55 = arith.mulf %50, %54 : vector<16x16x32xf32>
    %56 = arith.addf %49, %55 : vector<16x16x32xf32>
    %c2_29 = arith.constant 2 : index
    %c1_30 = arith.constant 1 : index
    %c0_31 = arith.constant 0 : index
    %57 = vector.load %arg6[%c2_29, %c1_30, %c0_31] : memref<18x18x32xf32, #tpu.memory_space<vmem>>, vector<16x16x32xf32>
    %58 = vector.extract_strided_slice %6 {offsets = [2, 1, 0], sizes = [1, 1, 32], strides = [1, 1, 1]} : vector<3x3x32xf32> to vector<1x1x32xf32>
    %59 = vector.shape_cast %58 : vector<1x1x32xf32> to vector<32xf32>
    %60 = vector.shape_cast %59 : vector<32xf32> to vector<1x1x32xf32>
    %61 = vector.broadcast %60 : vector<1x1x32xf32> to vector<16x16x32xf32>
    %62 = arith.mulf %57, %61 : vector<16x16x32xf32>
    %63 = arith.addf %56, %62 : vector<16x16x32xf32>
    %c2_32 = arith.constant 2 : index
    %c2_33 = arith.constant 2 : index
    %c0_34 = arith.constant 0 : index
    %64 = vector.load %arg6[%c2_32, %c2_33, %c0_34] : memref<18x18x32xf32, #tpu.memory_space<vmem>>, vector<16x16x32xf32>
    %65 = vector.extract_strided_slice %6 {offsets = [2, 2, 0], sizes = [1, 1, 32], strides = [1, 1, 1]} : vector<3x3x32xf32> to vector<1x1x32xf32>
    %66 = vector.shape_cast %65 : vector<1x1x32xf32> to vector<32xf32>
    %67 = vector.shape_cast %66 : vector<32xf32> to vector<1x1x32xf32>
    %68 = vector.broadcast %67 : vector<1x1x32xf32> to vector<16x16x32xf32>
    %69 = arith.mulf %64, %68 : vector<16x16x32xf32>
    %70 = arith.addf %63, %69 : vector<16x16x32xf32>
    %c0_35 = arith.constant 0 : index
    %c0_36 = arith.constant 0 : index
    %c0_37 = arith.constant 0 : index
    %71 = vector.load %arg3[%c0_35, %c0_36, %c0_37] : memref<1x1x32xf32, #tpu.memory_space<vmem>>, vector<1x1x32xf32>
    %72 = vector.broadcast %71 : vector<1x1x32xf32> to vector<16x16x32xf32>
    %73 = arith.mulf %70, %72 : vector<16x16x32xf32>
    %74 = arith.addf %4, %73 : vector<16x16x32xf32>
    %c0_38 = arith.constant 0 : index
    %c0_39 = arith.constant 0 : index
    %c0_40 = arith.constant 0 : index
    %75 = vector.load %arg4[%c0_38, %c0_39, %c0_40] : memref<1x1x32xf32, #tpu.memory_space<vmem>>, vector<1x1x32xf32>
    %76 = vector.broadcast %75 : vector<1x1x32xf32> to vector<16x16x32xf32>
    %77 = arith.addf %74, %76 : vector<16x16x32xf32>
    %c0_41 = arith.constant 0 : index
    %c0_42 = arith.constant 0 : index
    %c0_43 = arith.constant 0 : index
    %c0_44 = arith.constant 0 : index
    %78 = vector.load %arg5[%c0_41, %c0_42, %c0_43, %c0_44] : memref<1x16x16x32xf32, #tpu.memory_space<vmem>>, vector<1x16x16x32xf32>
    %79 = vector.shape_cast %78 : vector<1x16x16x32xf32> to vector<16x16x32xf32>
    %80 = vector.shape_cast %77 : vector<16x16x32xf32> to vector<1x16x16x32xf32>
    tpu.vector_store %arg5[%c0_41, %c0_42, %c0_43, %c0_44], %80 {strides = array<i32>} : memref<1x16x16x32xf32, #tpu.memory_space<vmem>>, vector<1x16x16x32xf32>,
    return
  }
  func.func @transform_0(%arg0: i32) -> (i32, i32, i32, i32) {
    %c0_i32 = arith.constant 0 : i32
    %c0_i32_0 = arith.constant 0 : i32
    %c0_i32_1 = arith.constant 0 : i32
    %c0_i32_2 = arith.constant 0 : i32
    return %arg0, %c0_i32, %c0_i32_0, %c0_i32_1 : i32, i32, i32, i32
  }
  func.func @transform_1(%arg0: i32) -> (i32, i32, i32) {
    %c0_i32 = arith.constant 0 : i32
    %c0_i32_0 = arith.constant 0 : i32
    %c0_i32_1 = arith.constant 0 : i32
    %c0_i32_2 = arith.constant 0 : i32
    return %c0_i32, %c0_i32_0, %c0_i32_1 : i32, i32, i32
  }
  func.func @transform_2(%arg0: i32) -> (i32, i32, i32) {
    %c0_i32 = arith.constant 0 : i32
    %c0_i32_0 = arith.constant 0 : i32
    %c0_i32_1 = arith.constant 0 : i32
    %c0_i32_2 = arith.constant 0 : i32
    return %c0_i32, %c0_i32_0, %c0_i32_1 : i32, i32, i32
  }
  func.func @transform_3(%arg0: i32) -> (i32, i32, i32) {
    %c0_i32 = arith.constant 0 : i32
    %c0_i32_0 = arith.constant 0 : i32
    %c0_i32_1 = arith.constant 0 : i32
    %c0_i32_2 = arith.constant 0 : i32
    return %c0_i32, %c0_i32_0, %c0_i32_1 : i32, i32, i32
  }
  func.func @transform_4(%arg0: i32) -> (i32, i32, i32, i32) {
    %c0_i32 = arith.constant 0 : i32
    %c0_i32_0 = arith.constant 0 : i32
    %c0_i32_1 = arith.constant 0 : i32
    %c0_i32_2 = arith.constant 0 : i32
    return %arg0, %c0_i32, %c0_i32_0, %c0_i32_1 : i32, i32, i32, i32
  }
}

</mosaic_0001>

<bundles_post_ra>
// kernel: residual_conv2d_bn.1
= control target key start
LH: loop header
LB: loop body
LE: loop exit
PB: predicated region body
PF: predicated region fallthrough
CT: control target
= control target key end

     0   :  { %9 = vsyncpa [#allocation4], 0  ;;  %s2898_s0 = inlined_call_operand.hbm [shape: f32[2,16,16,32], index: 0, kind: input, shape index: {}]   ;;  %s2899_s1 = inlined_call_operand.vmem [shape: f32[3,3,32], index: 1, kind: input, shape index: {}]   ;;  %s2900_s2 = inlined_call_operand.vmem [shape: f32[1,1,32], index: 2, kind: input, shape index: {}]   ;;  %s2901_s3 = inlined_call_operand.vmem [shape: f32[1,1,32], index: 3, kind: input, shape index: {}]   ;;  %s2902_s4 = inlined_call_operand.hbm [shape: f32[2,16,16,32], index: 4, kind: output, shape index: {}]  }
   0x1   :  { %11 = vsyncpa [#allocation4 + $0x1], 0 }
   0x2   :  { %12 = vsyncpa [#allocation5], 0 }
   0x3   :  { %14 = vsyncpa [#allocation5 + $0x1], 0  ;;  %s1646_s15 = smov 0   ;;  %s1648_s16 = smov 0  }
   0x4   :  { %s1650_s17 = smov 0   ;;  %s1652_s18 = smov 0  }
   0x5 LB: > { %s1667_s19 = sadd.s32 4294967295, %s1614_s18   ;;  %s1446_s20 = sadd.s32 4294967294, %s1614_s18   ;;  %s1614_s18 = sphi %s1652_s18, %s2960_s18   ;;  %s1610_s17 = sphi %s1650_s17, %s2959_s17   ;;  %s1606_s16 = sphi %s1648_s16, %s2958_s16   ;;  %s1602_s15 = sphi %s1646_s15, %s2957_s15  }
   0x6   : > { %s1671_s21 = sadd.s32 1, %s1614_s18   ;;  %s27_s22 = sadd.s32 1, %s1610_s17 }
   0x7   : > { %s24_s23 = ssub.s32 %s1614_s18, %s1671_s21  ;;  %p34_p0 = scmp.ne.s32.totalorder %s1610_s17, %s1606_s16 }
   0x8   : > { %p25_p1 = scmp.eq.s32.totalorder %s24_s23, 0  ;;  %p35_p2 = scmp.eq.s32.totalorder %s1614_s18, 0 }
   0x9   : > { %p40_p3 = scmp.ne.s32.totalorder %s1606_s16, %s1602_s15  ;;  %p41_p4 = scmp.eq.s32.totalorder %s1667_s19, 0 }
   0xa   : > { %s1683_s24 = scalar_select %p25_p1, %s1610_s17, %s27_s22  }
   0xb   : > { %p1685_p5 = por %p35_p2, %p34_p0  ;;  %p1689_p6 = por %p41_p4, %p40_p3 }
   0xc   : > { %p127_p7 = scmp.eq.s32.totalorder %s1667_s19, 1  ;;  %p133_p8 = scmp.eq.s32.totalorder %s1446_s20, 1 }
   0xd   : > { %p1475_p10 = scmp.lt.s32.totalorder %s1614_s18, 2  ;;  %s162_s29 = sand.u32 1, %s1610_s17  }
   0xe   : > { %p1696_p11 = por %p127_p7, %p34_p0  ;;  %p1700_p12 = por %p133_p8, %p40_p3 }
   0xf   : > { %s1461_s30 = sshll.u32 %s1614_s18, 8  ;;  %s1449_s5 = sshll.u32 %s162_s29, 8 }
  0x10   : > { %s171_s8 = scalar_lea.hbm %s2898_s0, %s1461_s30  ;;  %s166_s10 = scalar_lea.vmem [#allocation3], %s1449_s5 }
  0x11   : > { %s172_s9 = sshll.u32 %s171_s8, 4  ;;  %s174_s11 = sshll.u32 %s166_s10, 4  ;;  %s173_s9 = int_to_ptr.hbm [resolvable:$true] %s172_s9  ;;  %s175_s11 = int_to_ptr.vmem [resolvable:$true] %s174_s11 }
  0x12   : > { %p1711_p13 = pnand %p1475_p10, %p1685_p5  ;;  %p1452_p0 = scmp.ge.s32.totalorder %s1614_s18, 1 }
  0x13   : > { %p182_p1 = scmp.lt.s32.totalorder %s1614_s18, 3  ;;  %s163_s13 = scalar_lea.sflag [#allocation4], %s162_s29 }
  0x14   : > { %s1518_s14 = sshra.s32 %s173_s9, 4  ;;  %p1522_p3 = pneg %p1711_p13  ;;  %s1519_s14 = int_to_ptr.hbm [resolvable:$true] %s1518_s14 }
  0x15   : > { %s1520_s20 = scalar_lea.hbm %s1519_s14, 256  ;;  %s1525_s25 = scalar_lea.hbm %s2898_s0, 512 }
  0x16   : > { %p1521_p2 = scmp.ne.s32.totalorder %s1519_s14, %s1520_s20  ;;  %p1526_p5 = scmp.lt.s32.totalorder %s1519_s14, %s2898_s0 }
  0x17   : > { %p1527_p8 = scmp.lt.s32.totalorder %s1525_s25, %s1520_s20 }
  0x18   : > { %p1523_p4 = pnand %p1522_p3, %p1521_p2 }
  0x19   : > { %p1528_p10 = por %p1527_p8, %p1526_p5 }
  0x1a   : > { %p1524_p7 = pneg %p1523_p4 }
  0x1c   : > { %p1529_p9 = pnand %p1528_p10, %p1524_p7 }
  0x1e   : > { %1532 = shalt.err (!%p1529_p9)
}
  0x1f   : > { %s1616_s29 = smov 128   ;;  %s1617_s6 = smov 8  }
  0x20   : > { %1470 = dma.hbm_to_vmem [thread:$0]  (!%p1711_p13), %s173_s9, 4096, %s175_s11, %s163_s13, %s1616_s29, %s1616_s29, %s1617_s6  }
  0x21   : > { %p183_p2 = pnand %p1452_p0, %p182_p1 }
  0x23   : > { %186 = sbr.rel (%p183_p2) target bundleno = 312 (0x138), region = 36 }
  0x28   : > { %s1732_s7 = sand.u32 1, %s1606_s16  }
  0x29   : > { %s1453_s8 = sshll.u32 %s1732_s7, 8  ;;  %s189_s10 = scalar_lea.sflag [#allocation4], %s1732_s7 }
  0x2a   : > { %s1736_s14 = scalar_lea.vmem [#allocation3], %s1453_s8 }
  0x2b   : > { %1593 = dma.done.wait (%p1689_p6), %s189_s10, 4096  }
  0x2c   : > { %1595 = vsyncadd (%p1689_p6), %s189_s10, 4294963200  ;;  %s1742_s9 = scalar_lea.vmem [#allocation6], %s1453_s8  ;;  %p1455_p9 = scmp.ne.s32.totalorder %s1667_s19, 0 }
  0x2e   : > { %221 = sbr.rel (%p1455_p9) target bundleno = 106 (0x6a), region = 44 }
  0x33   : > { %vm222_vm0 = vcmask 261120   ;;  %v1618_v0 = vmov 0.0   ;;  %vm225_vm1 = vcmask 254976  }
  0x34   : > { %223 = vst.msk [vmem:[#allocation2] sm:$0xff] %vm222_vm0, %v1618_v0 }
  0x35   : > { %224 = vst.msk [vmem:[#allocation2 + $0x8] sm:$0xff] %vm222_vm0, %v1618_v0 }
  0x36   : > { %227 = vst.msk [vmem:[#allocation2 + $0x18] sm:$0xff] %vm222_vm0, %v1618_v0 }
  0x37   : > { %228 = vst.msk [vmem:[#allocation2 + $0x20] sm:$0xff] %vm222_vm0, %v1618_v0 }
  0x38   : > { %230 = vst.msk [vmem:[#allocation2 + $0x30] sm:$0xff] %vm222_vm0, %v1618_v0 }
  0x39   : > { %231 = vst.msk [vmem:[#allocation2 + $0x38] sm:$0xff] %vm222_vm0, %v1618_v0 }
  0x3a   : > { %233 = vst.msk [vmem:[#allocation2 + $0x48] sm:$0xff] %vm222_vm0, %v1618_v0 }
  0x3b   : > { %234 = vst.msk [vmem:[#allocation2 + $0x50] sm:$0xff] %vm222_vm0, %v1618_v0 }
  0x3c   : > { %236 = vst.msk [vmem:[#allocation2 + $0x60] sm:$0xff] %vm222_vm0, %v1618_v0 }
  0x3d   : > { %237 = vst.msk [vmem:[#allocation2 + $0x68] sm:$0xff] %vm222_vm0, %v1618_v0 }
  0x3e   : > { %239 = vst.msk [vmem:[#allocation2 + $0x78] sm:$0xff] %vm222_vm0, %v1618_v0 }
  0x3f   : > { %240 = vst.msk [vmem:[#allocation2 + $0x80] sm:$0xff] %vm222_vm0, %v1618_v0 }
  0x40   : > { %242 = vst.msk [vmem:[#allocation2 + $0x90] sm:$0xff] %vm222_vm0, %v1618_v0 }
  0x41   : > { %243 = vst.msk [vmem:[#allocation2 + $0x98] sm:$0xff] %vm222_vm0, %v1618_v0 }
  0x42   : > { %245 = vst.msk [vmem:[#allocation2 + $0xa8] sm:$0xff] %vm222_vm0, %v1618_v0 }
  0x43   : > { %246 = vst.msk [vmem:[#allocation2 + $0xb0] sm:$0xff] %vm222_vm0, %v1618_v0 }
  0x44   : > { %248 = vst.msk [vmem:[#allocation2 + $0xc0] sm:$0xff] %vm222_vm0, %v1618_v0 }
  0x45   : > { %249 = vst.msk [vmem:[#allocation2 + $0xc8] sm:$0xff] %vm222_vm0, %v1618_v0 }
  0x46   : > { %251 = vst.msk [vmem:[#allocation2 + $0xd8] sm:$0xff] %vm222_vm0, %v1618_v0 }
  0x47   : > { %252 = vst.msk [vmem:[#allocation2 + $0xe0] sm:$0xff] %vm222_vm0, %v1618_v0 }
  0x48   : > { %254 = vst.msk [vmem:[#allocation2 + $0xf0] sm:$0xff] %vm222_vm0, %v1618_v0 }
  0x49   : > { %255 = vst.msk [vmem:[#allocation2 + $0xf8] sm:$0xff] %vm222_vm0, %v1618_v0 }
  0x4a   : > { %257 = vst.msk [vmem:[#allocation2 + $0x108] sm:$0xff] %vm222_vm0, %v1618_v0 }
  0x4b   : > { %258 = vst.msk [vmem:[#allocation2 + $0x110] sm:$0xff] %vm222_vm0, %v1618_v0 }
  0x4c   : > { %260 = vst.msk [vmem:[#allocation2 + $0x120] sm:$0xff] %vm222_vm0, %v1618_v0 }
  0x4d   : > { %261 = vst.msk [vmem:[#allocation2 + $0x128] sm:$0xff] %vm222_vm0, %v1618_v0 }
  0x4e   : > { %263 = vst.msk [vmem:[#allocation2 + $0x138] sm:$0xff] %vm222_vm0, %v1618_v0 }
  0x4f   : > { %264 = vst.msk [vmem:[#allocation2 + $0x140] sm:$0xff] %vm222_vm0, %v1618_v0 }
  0x50   : > { %266 = vst.msk [vmem:[#allocation2 + $0x150] sm:$0xff] %vm222_vm0, %v1618_v0 }
  0x51   : > { %267 = vst.msk [vmem:[#allocation2 + $0x158] sm:$0xff] %vm222_vm0, %v1618_v0 }
  0x52   : > { %269 = vst.msk [vmem:[#allocation2 + $0x168] sm:$0xff] %vm222_vm0, %v1618_v0 }
  0x53   : > { %270 = vst.msk [vmem:[#allocation2 + $0x170] sm:$0xff] %vm222_vm0, %v1618_v0 }
  0x54   : > { %272 = vst.msk [vmem:[#allocation2 + $0x180] sm:$0xff] %vm222_vm0, %v1618_v0 }
  0x55   : > { %273 = vst.msk [vmem:[#allocation2 + $0x188] sm:$0xff] %vm222_vm0, %v1618_v0 }
  0x56   : > { %275 = vst.msk [vmem:[#allocation2 + $0x198] sm:$0xff] %vm222_vm0, %v1618_v0 }
  0x57   : > { %276 = vst.msk [vmem:[#allocation2 + $0x1a0] sm:$0xff] %vm222_vm0, %v1618_v0 }
  0x58   : > { %226 = vst.msk [vmem:[#allocation2 + $0x10] sm:$0x3] %vm225_vm1, %v1618_v0 }
  0x59   : > { %229 = vst.msk [vmem:[#allocation2 + $0x28] sm:$0x3] %vm225_vm1, %v1618_v0 }
  0x5a   : > { %232 = vst.msk [vmem:[#allocation2 + $0x40] sm:$0x3] %vm225_vm1, %v1618_v0 }
  0x5b   : > { %235 = vst.msk [vmem:[#allocation2 + $0x58] sm:$0x3] %vm225_vm1, %v1618_v0 }
  0x5c   : > { %238 = vst.msk [vmem:[#allocation2 + $0x70] sm:$0x3] %vm225_vm1, %v1618_v0 }
  0x5d   : > { %241 = vst.msk [vmem:[#allocation2 + $0x88] sm:$0x3] %vm225_vm1, %v1618_v0 }
  0x5e   : > { %244 = vst.msk [vmem:[#allocation2 + $0xa0] sm:$0x3] %vm225_vm1, %v1618_v0 }
  0x5f   : > { %247 = vst.msk [vmem:[#allocation2 + $0xb8] sm:$0x3] %vm225_vm1, %v1618_v0 }
  0x60   : > { %250 = vst.msk [vmem:[#allocation2 + $0xd0] sm:$0x3] %vm225_vm1, %v1618_v0 }
  0x61   : > { %253 = vst.msk [vmem:[#allocation2 + $0xe8] sm:$0x3] %vm225_vm1, %v1618_v0 }
  0x62   : > { %256 = vst.msk [vmem:[#allocation2 + $0x100] sm:$0x3] %vm225_vm1, %v1618_v0 }
  0x63   : > { %259 = vst.msk [vmem:[#allocation2 + $0x118] sm:$0x3] %vm225_vm1, %v1618_v0 }
  0x64   : > { %262 = vst.msk [vmem:[#allocation2 + $0x130] sm:$0x3] %vm225_vm1, %v1618_v0 }
  0x65   : > { %265 = vst.msk [vmem:[#allocation2 + $0x148] sm:$0x3] %vm225_vm1, %v1618_v0 }
  0x66   : > { %268 = vst.msk [vmem:[#allocation2 + $0x160] sm:$0x3] %vm225_vm1, %v1618_v0 }
  0x67   : > { %271 = vst.msk [vmem:[#allocation2 + $0x178] sm:$0x3] %vm225_vm1, %v1618_v0 }
  0x68   : > { %274 = vst.msk [vmem:[#allocation2 + $0x190] sm:$0x3] %vm225_vm1, %v1618_v0 }
  0x69   : > { %277 = vst.msk [vmem:[#allocation2 + $0x1a8] sm:$0x3] %vm225_vm1, %v1618_v0 }
  0x6a PF: > { %v1800_v1 = vld [vmem:[%s1736_s14] sm:$0xff]  ;;  %vm311_vm2 = vcmask 261120   ;;  %v1803_v2 = vld [vmem:[%s1736_s14 + $0x8] sm:$0xff]  ;;  %v1806_v3 = vld [vmem:[%s1736_s14 + $0x10] sm:$0xff]  ;;  %s1358_s20 = scalar_lea.sflag [#allocation5], %s1732_s7  ;;  %s1568_s5 = scalar_lea.hbm %s2902_s4, 512 }
  0x6b   : > { %312 = vst.msk [vmem:[#allocation2 + $0x19] sm:$0xff] %vm311_vm2, %v1800_v1  ;;  %v1811_v4 = vld [vmem:[%s1736_s14 + $0x18] sm:$0xff]  ;;  %v1816_v5 = vld [vmem:[%s1736_s14 + $0x20] sm:$0xff]  ;;  %v1821_v6 = vld [vmem:[%s1736_s14 + $0x28] sm:$0xff] }
  0x6c   : > { %313 = vst.msk [vmem:[#allocation2 + $0x21] sm:$0xff] %vm311_vm2, %v1803_v2  ;;  %v1826_v7 = vld [vmem:[%s1736_s14 + $0x30] sm:$0xff]  ;;  %v1831_v8 = vld [vmem:[%s1736_s14 + $0x38] sm:$0xff]  ;;  %v1836_v9 = vld [vmem:[%s1736_s14 + $0x40] sm:$0xff] }
  0x6d   : > { %314 = vst.msk [vmem:[#allocation2 + $0x31] sm:$0xff] %vm311_vm2, %v1806_v3  ;;  %v1841_v10 = vld [vmem:[%s1736_s14 + $0x48] sm:$0xff]  ;;  %v1846_v11 = vld [vmem:[%s1736_s14 + $0x50] sm:$0xff]  ;;  %v1851_v12 = vld [vmem:[%s1736_s14 + $0x58] sm:$0xff] }
  0x6e   : > { %315 = vst.msk [vmem:[#allocation2 + $0x39] sm:$0xff] %vm311_vm2, %v1811_v4  ;;  %v1854_v13 = vld [vmem:[%s1736_s14 + $0x60] sm:$0xff]  ;;  %v1859_v14 = vld [vmem:[%s1736_s14 + $0x68] sm:$0xff]  ;;  %v1862_v15 = vld [vmem:[%s1736_s14 + $0x70] sm:$0xff] }
  0x6f   : > { %316 = vst.msk [vmem:[#allocation2 + $0x49] sm:$0xff] %vm311_vm2, %v1816_v5  ;;  %v344_v16 = vld [vmem:[%s2899_s1] sm:$0x7]  ;;  %v345_v17 = vld [vmem:[%s2899_s1 + $0x4] sm:$0x7]  ;;  %v1880_v20 = vld [vmem:[%s1736_s14 + $0x78] sm:$0xff] }
  0x70   : > { %317 = vst.msk [vmem:[#allocation2 + $0x51] sm:$0xff] %vm311_vm2, %v1821_v6  ;;  %v346_v18 = vld [vmem:[%s2899_s1 + $0x8] sm:$0x7]  ;;  %v1875_v19 = vperm.slane %v344_v16, 0  ;;  %v1882_v21 = vperm.slane %v344_v16, 1  ;;  %v1884_v22 = vperm.slane %v344_v16, 2 }
  0x71   : > { %318 = vst.msk [vmem:[#allocation2 + $0x61] sm:$0xff] %vm311_vm2, %v1826_v7  ;;  %v1886_v23 = vperm.slane %v345_v17, 0  ;;  %v347_v24 = vld [vmem:[#allocation2] sm:$0xff]  ;;  %v1891_v25 = vld [vmem:[%s1736_s14 + $0x80] sm:$0xff]  ;;  %v1894_v26 = vld [vmem:[%s1736_s14 + $0x88] sm:$0xff]  ;;  %v1896_v27 = vperm.slane %v345_v17, 1 }
  0x72   : > { %319 = vst.msk [vmem:[#allocation2 + $0x69] sm:$0xff] %vm311_vm2, %v1831_v8  ;;  %v444_v28 = vld [vmem:[#allocation2 + $0x1] sm:$0xff]  ;;  %v1903_v30 = vperm.slane %v345_v17, 2  ;;  %v380_v31 = vmul.f32 %v1875_v19, %v347_v24  ;;  %v638_v34 = vld [vmem:[#allocation2 + $0x18] sm:$0xff]  ;;  %v1912_v37 = vperm.slane %v346_v18, 0  ;;  %v1919_v42 = vld [vmem:[%s1736_s14 + $0xa0] sm:$0xff] }
  0x73   : > { %320 = vst.msk [vmem:[#allocation2 + $0x79] sm:$0xff] %vm311_vm2, %v1836_v9  ;;  %v1901_v29 = vld [vmem:[%s1736_s14 + $0x90] sm:$0xff]  ;;  %v477_v32 = vmul.f32 %v1882_v21, %v444_v28  ;;  %v1910_v35 = vld [vmem:[%s1736_s14 + $0x98] sm:$0xff]  ;;  %v382_v41 = vmul.f32 %v638_v34, %v1875_v19  ;;  %v1921_v43 = vperm.slane %v346_v18, 1  ;;  %v1923_v44 = vperm.slane %v346_v18, 2  ;;  %v1933_v49 = vld [vmem:[%s1736_s14 + $0xa8] sm:$0xff] }
  0x74   : > { %321 = vst.msk [vmem:[#allocation2 + $0x81] sm:$0xff] %vm311_vm2, %v1841_v10  ;;  %v541_v33 = vld [vmem:[#allocation2 + $0x2] sm:$0xff]  ;;  %v735_v39 = vld [vmem:[#allocation2 + $0x19] sm:$0xff]  ;;  %v671_v46 = vmul.f32 %v1886_v23, %v638_v34  ;;  %v1926_v47 = vld [vmem:[#allocation2 + $0x30] sm:$0xff] }
  0x75   : > { %2924 = vst [vmem:[#allocation9_spill] sm:$0xff] %v1859_v14  ;;  %v961_v36 = vld [vmem:[#allocation2 + $0x1a0] sm:$0xff]  ;;  %v574_v38 = vmul.f32 %v1884_v22, %v541_v33  ;;  %v509_v45 = vadd.f32 %v477_v32, %v380_v31  ;;  %v1928_v48 = vld [vmem:[#allocation2 + $0x31] sm:$0xff]  ;;  %v348_v52 = vld [vmem:[#allocation2 + $0x8] sm:$0xff]  ;;  %v479_v53 = vmul.f32 %v735_v39, %v1882_v21  ;;  %v768_v56 = vmul.f32 %v1896_v27, %v735_v39 }
  0x76   : > { %2925 = vst [vmem:[#allocation10_spill] sm:$0xff] %v1862_v15  ;;  %v832_v40 = vld [vmem:[#allocation2 + $0x1a] sm:$0xff]  ;;  %v1936_v50 = vmul.f32 %v1912_v37, %v961_v36  ;;  %v1938_v51 = vld [vmem:[#allocation2 + $0x32] sm:$0xff]  ;;  %v381_v58 = vmul.f32 %v1875_v19, %v348_v52  ;;  %v445_v59 = vld [vmem:[#allocation2 + $0x9] sm:$0xff]  ;;  %v963_v62 = vmul.f32 %v1912_v37, %v1926_v47  ;;  %v1060_v28 = vmul.f32 %v1921_v43, %v1928_v48 }
  0x77   : > { %322 = vst.msk [vmem:[#allocation2 + $0x91] sm:$0xff] %vm311_vm2, %v1846_v11  ;;  %v1058_v54 = vld [vmem:[#allocation2 + $0x1a1] sm:$0xff]  ;;  %v606_v55 = vadd.f32 %v574_v38, %v509_v45  ;;  %v865_v57 = vmul.f32 %v1903_v30, %v832_v40  ;;  %v542_v60 = vld [vmem:[#allocation2 + $0xa] sm:$0xff]  ;;  %v478_v63 = vmul.f32 %v1882_v21, %v445_v59  ;;  %v511_v18 = vadd.f32 %v479_v53, %v382_v41  ;;  %v1963_v33 = vld [vmem:[#allocation2 + $0x38] sm:$0xff] }
  0x78   : > { %323 = vst.msk [vmem:[#allocation2 + $0x99] sm:$0xff] %vm311_vm2, %v1851_v12  ;;  %v1949_v61 = vld [vmem:[%s1736_s14 + $0xb0] sm:$0xff]  ;;  %v575_v0 = vmul.f32 %v1884_v22, %v542_v60  ;;  %v1961_v31 = vmul.f32 %v1923_v44, %v1938_v51  ;;  %v576_v36 = vmul.f32 %v832_v40, %v1884_v22  ;;  %v1971_v38 = vld [vmem:[%s1736_s14 + $0xb8] sm:$0xff]  ;;  %v1974_v39 = vmul.f32 %v1921_v43, %v1058_v54  ;;  %v1984_v40 = vld [vmem:[%s1736_s14 + $0xc0] sm:$0xff] }
  0x79   : > { %2926 = vst [vmem:[#allocation11_spill] sm:$0xff] %v1880_v20  ;;  %v639_v16 = vld [vmem:[#allocation2 + $0x20] sm:$0xff]  ;;  %v703_v24 = vadd.f32 %v671_v46, %v606_v55  ;;  %v510_v41 = vadd.f32 %v478_v63, %v381_v58  ;;  %v673_v52 = vmul.f32 %v1926_v47, %v1886_v23  ;;  %v1988_v58 = vld [vmem:[#allocation2 + $0x48] sm:$0xff]  ;;  %v1993_v60 = vld [vmem:[%s1736_s14 + $0xc8] sm:$0xff] }
  0x7a   : > { %324 = vst.msk [vmem:[#allocation2 + $0xa9] sm:$0xff] %vm311_vm2, %v1854_v13  ;;  %v736_v17 = vld [vmem:[#allocation2 + $0x21] sm:$0xff]  ;;  %v1965_v34 = vld [vmem:[#allocation2 + $0x39] sm:$0xff]  ;;  %v672_v45 = vmul.f32 %v1886_v23, %v639_v16  ;;  %v608_v59 = vadd.f32 %v576_v36, %v511_v18  ;;  %v2003_v18 = vld [vmem:[#allocation2 + $0x49] sm:$0xff] }
  0x7b   : > { %2927 = vst [vmem:[#allocation12_spill] sm:$0xff] %v1891_v25  ;;  %v833_v32 = vld [vmem:[#allocation2 + $0x22] sm:$0xff]  ;;  %v1977_v46 = vld [vmem:[#allocation2 + $0x3a] sm:$0xff]  ;;  %v800_v53 = vadd.f32 %v768_v56, %v703_v24  ;;  %v769_v55 = vmul.f32 %v1896_v27, %v736_v17  ;;  %v607_v63 = vadd.f32 %v575_v0, %v510_v41  ;;  %v1061_v56 = vmul.f32 %v1921_v43, %v1965_v34  ;;  %v2005_v36 = vld [vmem:[#allocation2 + $0x4a] sm:$0xff] }
  0x7c   : > { %2928 = vst [vmem:[#allocation13_spill] sm:$0xff] %v1894_v26  ;;  %v866_v54 = vmul.f32 %v1903_v30, %v833_v32  ;;  %v2001_v24 = vmul.f32 %v1923_v44, %v1977_v46  ;;  %v705_v41 = vadd.f32 %v673_v52, %v608_v59  ;;  %v2028_v52 = vld [vmem:[%s1736_s14 + $0xe0] sm:$0xff]  ;;  %v1062_v59 = vmul.f32 %v1921_v43, %v2003_v18 }
  0x7d   : > { %325 = vst.msk [vmem:[#allocation2 + $0xb1] sm:$0xff] %vm311_vm2, %v1859_v14  ;;  %v897_v0 = vadd.f32 %v865_v57, %v800_v53  ;;  %v480_v57 = vmul.f32 %v736_v17, %v1882_v21  ;;  %v2067_v14 = vld [vmem:[#allocation2 + $0x52] sm:$0xff] }
  0x7e   : > { %2929 = vst [vmem:[#allocation14_spill] sm:$0xff] %v1901_v29 }
  0x7f   : > { %326 = vst.msk [vmem:[#allocation2 + $0xc1] sm:$0xff] %vm311_vm2, %v1862_v15  ;;  %v868_v15 = vmul.f32 %v1977_v46, %v1903_v30 }
  0x80   : > { %2930 = vst [vmem:[#allocation15_spill] sm:$0xff] %v1910_v35 }
  0x81   : > { %327 = vst.msk [vmem:[#allocation2 + $0xc9] sm:$0xff] %vm311_vm2, %v1880_v20 }
  0x82   : > { %2931 = vst [vmem:[#allocation16_spill] sm:$0xff] %v1919_v42 }
  0x83   : > { %328 = vst.msk [vmem:[#allocation2 + $0xd9] sm:$0xff] %vm311_vm2, %v1891_v25  ;;  %v867_v25 = vmul.f32 %v1938_v51, %v1903_v30 }
  0x84   : > { %2932 = vst [vmem:[#allocation17_spill] sm:$0xff] %v1933_v49 }
  0x85   : > { %329 = vst.msk [vmem:[#allocation2 + $0xe1] sm:$0xff] %vm311_vm2, %v1894_v26  ;;  %v704_v26 = vadd.f32 %v672_v45, %v607_v63  ;;  %v1159_v45 = vmul.f32 %v1923_v44, %v2005_v36  ;;  %v2037_v63 = vld [vmem:[%s1736_s14 + $0xe8] sm:$0xff] }
  0x86   : > { %330 = vst.msk [vmem:[#allocation2 + $0xf1] sm:$0xff] %vm311_vm2, %v1901_v29  ;;  %v2018_v29 = vld [vmem:[%s1736_s14 + $0xd8] sm:$0xff] }
  0x87   : > { %2933 = vst [vmem:[#allocation18_spill] sm:$0xff] %v1949_v61  ;;  %v801_v17 = vadd.f32 %v769_v55, %v704_v26  ;;  %v384_v55 = vmul.f32 %v1926_v47, %v1875_v19 }
  0x88   : > { %331 = vst.msk [vmem:[#allocation2 + $0xf9] sm:$0xff] %vm311_vm2, %v1910_v35  ;;  %v383_v35 = vmul.f32 %v639_v16, %v1875_v19  ;;  %v995_v16 = vadd.f32 %v963_v62, %v897_v0  ;;  %v674_v62 = vmul.f32 %v1963_v33, %v1886_v23  ;;  %v2044_v0 = vld [vmem:[#allocation2 + $0x51] sm:$0xff] }
  0x89   : > { %332 = vst.msk [vmem:[#allocation2 + $0x109] sm:$0xff] %vm311_vm2, %v1919_v42  ;;  %v770_v42 = vmul.f32 %v1928_v48, %v1896_v27 }
  0x8a   : > { %2934 = vst [vmem:[#allocation19_spill] sm:$0xff] %v1971_v38  ;;  %v1092_v26 = vadd.f32 %v1060_v28, %v995_v16 }
  0x8b   : > { %333 = vst.msk [vmem:[#allocation2 + $0x111] sm:$0xff] %vm311_vm2, %v1933_v49  ;;  %v964_v49 = vmul.f32 %v1912_v37, %v1963_v33  ;;  %v802_v53 = vadd.f32 %v770_v42, %v705_v41  ;;  %v2042_v42 = vld [vmem:[#allocation2 + $0x50] sm:$0xff]  ;;  %v2049_v41 = vld [vmem:[%s1736_s14 + $0xf0] sm:$0xff] }
  0x8c   : > { %2935 = vst [vmem:[#allocation20_spill] sm:$0xff] %v1984_v40  ;;  %v1189_v47 = vadd.f32 %v1961_v31, %v1092_v26  ;;  %v966_v16 = vmul.f32 %v1912_v37, %v2042_v42  ;;  %v1160_v26 = vmul.f32 %v1923_v44, %v2067_v14 }
  0x8d   : > { %334 = vst.msk [vmem:[#allocation2 + $0x121] sm:$0xff] %vm311_vm2, %v1949_v61  ;;  %v2010_v61 = vld [vmem:[%s1736_s14 + $0xd0] sm:$0xff] }
  0x8e   : > { %2936 = vst [vmem:[#allocation21_spill] sm:$0xff] %v1993_v60 }
  0x8f   : > { %335 = vst.msk [vmem:[#allocation2 + $0x129] sm:$0xff] %vm311_vm2, %v1971_v38  ;;  %v965_v38 = vmul.f32 %v1912_v37, %v1988_v58 }
  0x90   : > { %2937 = vst [vmem:[#allocation22_spill] sm:$0xff] %v2010_v61 }
  0x91   : > { %336 = vst.msk [vmem:[#allocation2 + $0x139] sm:$0xff] %vm311_vm2, %v1984_v40  ;;  %v512_v40 = vadd.f32 %v480_v57, %v383_v35  ;;  %v899_v35 = vadd.f32 %v867_v25, %v802_v53  ;;  %v2063_v57 = vld [vmem:[%s1736_s14 + $0xf8] sm:$0xff]  ;;  %v481_v25 = vmul.f32 %v1928_v48, %v1882_v21  ;;  %v578_v48 = vmul.f32 %v1938_v51, %v1884_v22  ;;  %s1462_s14 = sshll.u32 %s1667_s19, 8  ;;  %s1370_s19 = sshll.u32 %s1742_s9, 4  ;;  %s1371_s19 = int_to_ptr.vmem [resolvable:$true] %s1370_s19 }
  0x92   : > { %2938 = vst [vmem:[#allocation23_spill] sm:$0xff] %v2018_v29  ;;  %s1369_s12 = scalar_lea.hbm %s2902_s4, %s1462_s14 }
  0x93   : > { %337 = vst.msk [vmem:[#allocation2 + $0x141] sm:$0xff] %vm311_vm2, %v1993_v60  ;;  %v577_v60 = vmul.f32 %v833_v32, %v1884_v22  ;;  %v771_v32 = vmul.f32 %v1965_v34, %v1896_v27  ;;  %v997_v28 = vadd.f32 %v965_v38, %v899_v35  ;;  %v513_v53 = vadd.f32 %v481_v25, %v384_v55  ;;  %v2088_v38 = vld [vmem:[%s2901_s3] ss:$0 sm:$0xff]  ;;  %s1372_s13 = sshll.u32 %s1369_s12, 4  ;;  %s1373_s13 = int_to_ptr.hbm [resolvable:$true] %s1372_s13 }
  0x94   : > { %338 = vst.msk [vmem:[#allocation2 + $0x151] sm:$0xff] %vm311_vm2, %v2010_v61  ;;  %v2054_v61 = vld [vmem:[%s2900_s2] ss:$0 sm:$0xff]  ;;  %s1562_s22 = sshra.s32 %s1373_s13, 4  ;;  %s1563_s22 = int_to_ptr.hbm [resolvable:$true] %s1562_s22 }
  0x95   : > { %339 = vst.msk [vmem:[#allocation2 + $0x159] sm:$0xff] %vm311_vm2, %v2018_v29  ;;  %v898_v29 = vadd.f32 %v866_v54, %v801_v17  ;;  %v609_v20 = vadd.f32 %v577_v60, %v512_v40  ;;  %v1063_v40 = vmul.f32 %v1921_v43, %v2044_v0  ;;  %v1225_v31 = vmul.f32 %v2054_v61, %v1189_v47  ;;  %v2096_v35 = vld [vmem:[#allocation2 + $0x60] sm:$0xff]  ;;  %s1564_s23 = scalar_lea.hbm %s1563_s22, 256  ;;  %p1569_p1 = scmp.lt.s32.totalorder %s1563_s22, %s2902_s4 }
  0x96   : > { %2939 = vst [vmem:[#allocation24_spill] sm:$0xff] %v2049_v41  ;;  %v1094_v17 = vadd.f32 %v1062_v59, %v997_v28  ;;  %v610_v51 = vadd.f32 %v578_v48, %v513_v53  ;;  %v385_v59 = vmul.f32 %v1963_v33, %v1875_v19  ;;  %v482_v47 = vmul.f32 %v1965_v34, %v1882_v21  ;;  %p1565_p6 = scmp.ne.s32.totalorder %s1563_s22, %s1564_s23  ;;  %p1570_p3 = scmp.lt.s32.totalorder %s1568_s5, %s1564_s23 }
  0x97   : > { %340 = vst.msk [vmem:[#allocation2 + $0x169] sm:$0xff] %vm311_vm2, %v2028_v52  ;;  %v996_v54 = vadd.f32 %v964_v49, %v898_v29  ;;  %v706_v60 = vadd.f32 %v674_v62, %v609_v20  ;;  %v675_v20 = vmul.f32 %v1988_v58, %v1886_v23  ;;  %v772_v62 = vmul.f32 %v2003_v18, %v1896_v27 }
  0x98   : > { %341 = vst.msk [vmem:[#allocation2 + $0x171] sm:$0xff] %vm311_vm2, %v2037_v63  ;;  %v1257_v55 = vadd.f32 %v1225_v31, %v1800_v1  ;;  %v1191_v25 = vadd.f32 %v1159_v45, %v1094_v17  ;;  %v967_v33 = vmul.f32 %v1912_v37, %v2096_v35  ;;  %v514_v45 = vadd.f32 %v482_v47, %v385_v59  ;;  %p1566_p13 = pnand %p1565_p6, %p1696_p11  ;;  %p1571_p4 = por %p1570_p3, %p1569_p1 }
  0x99   : > { %342 = vst.msk [vmem:[#allocation2 + $0x181] sm:$0xff] %vm311_vm2, %v2049_v41  ;;  %v1093_v29 = vadd.f32 %v1061_v56, %v996_v54  ;;  %v803_v49 = vadd.f32 %v771_v32, %v706_v60  ;;  %v707_v56 = vadd.f32 %v675_v20, %v610_v51  ;;  %v869_v32 = vmul.f32 %v2005_v36, %v1903_v30  ;;  %v2106_v54 = vld [vmem:[#allocation2 + $0x61] sm:$0xff] }
  0x9a   : > { %343 = vst.msk [vmem:[#allocation2 + $0x189] sm:$0xff] %vm311_vm2, %v2063_v57  ;;  %v1293_v60 = vadd.f32 %v2088_v38, %v1257_v55  ;;  %v1227_v1 = vmul.f32 %v2054_v61, %v1191_v25  ;;  %v579_v17 = vmul.f32 %v1977_v46, %v1884_v22  ;;  %v1064_v51 = vmul.f32 %v1921_v43, %v2106_v54  ;;  %p1567_p0 = pneg %p1566_p13 }
  0x9b   : > { %v1190_v28 = vadd.f32 %v2001_v24, %v1093_v29  ;;  %v900_v41 = vadd.f32 %v868_v15, %v803_v49  ;;  %v804_v31 = vadd.f32 %v772_v62, %v707_v56 }
  0x9c   : > { %1325 = vst.msk [vmem:[%s1742_s9] sm:$0xff] %vm311_vm2, %v1293_v60  ;;  %v1259_v49 = vadd.f32 %v1227_v1, %v1806_v3  ;;  %v611_v62 = vadd.f32 %v579_v17, %v514_v45  ;;  %v676_v3 = vmul.f32 %v2042_v42, %v1886_v23  ;;  %p1572_p7 = pnand %p1571_p4, %p1567_p0 }
  0x9d   : > { %v1226_v15 = vmul.f32 %v2054_v61, %v1190_v28  ;;  %v998_v24 = vadd.f32 %v966_v16, %v900_v41  ;;  %v901_v41 = vadd.f32 %v869_v32, %v804_v31  ;;  %v2123_v16 = vld [vmem:[#allocation2 + $0x62] sm:$0xff] }
  0x9e   : > { %v1295_v1 = vadd.f32 %v2088_v38, %v1259_v49  ;;  %v1161_v45 = vmul.f32 %v1923_v44, %v2123_v16  ;;  %v2145_v49 = vld [vmem:[#allocation2 + $0x69] sm:$0xff] }
  0x9f   : > { %v378_v53 = vld [vmem:[#allocation2 + $0x170] sm:$0xff]  ;;  %v1258_v25 = vadd.f32 %v1226_v15, %v1803_v2  ;;  %v1095_v59 = vadd.f32 %v1063_v40, %v998_v24  ;;  %v999_v40 = vadd.f32 %v967_v33, %v901_v41  ;;  %v2135_v15 = vld [vmem:[#allocation2 + $0x68] sm:$0xff] }
  0xa0   : > { %v475_v34 = vld [vmem:[#allocation2 + $0x171] sm:$0xff]  ;;  %v411_v20 = vmul.f32 %v1875_v19, %v378_v53  ;;  %1327 = vst.msk [vmem:[%s1742_s9 + $0x10] sm:$0xff] %vm311_vm2, %v1295_v1 }
  0xa1   : > { %v572_v48 = vld [vmem:[#allocation2 + $0x172] sm:$0xff]  ;;  %v508_v29 = vmul.f32 %v1882_v21, %v475_v34  ;;  %v669_v55 = vld [vmem:[#allocation2 + $0x188] sm:$0xff]  ;;  %v1294_v60 = vadd.f32 %v2088_v38, %v1258_v25  ;;  %v1192_v2 = vadd.f32 %v1160_v26, %v1095_v59  ;;  %v708_v34 = vadd.f32 %v676_v3, %v611_v62 }
  0xa2   : > { %v605_v47 = vmul.f32 %v1884_v22, %v572_v48  ;;  %v702_v28 = vmul.f32 %v1886_v23, %v669_v55  ;;  %v766_v56 = vld [vmem:[#allocation2 + $0x189] sm:$0xff]  ;;  %v773_v48 = vmul.f32 %v2044_v0, %v1896_v27  ;;  %v1096_v17 = vadd.f32 %v1064_v51, %v999_v40 }
  0xa3   : > { %v540_v46 = vadd.f32 %v508_v29, %v411_v20  ;;  %v863_v53 = vld [vmem:[#allocation2 + $0x18a] sm:$0xff]  ;;  %v799_v24 = vmul.f32 %v1896_v27, %v766_v56  ;;  %1326 = vst.msk [vmem:[%s1742_s9 + $0x8] sm:$0xff] %vm311_vm2, %v1294_v60  ;;  %v1228_v31 = vmul.f32 %v2054_v61, %v1192_v2  ;;  %v870_v26 = vmul.f32 %v2067_v14, %v1903_v30  ;;  %v1155_v20 = vld [vmem:[#allocation2 + $0x1a2] sm:$0xff] }
  0xa4   : > { %v805_v29 = vadd.f32 %v773_v48, %v708_v34  ;;  %v386_v55 = vmul.f32 %v1988_v58, %v1875_v19  ;;  %v483_v25 = vmul.f32 %v2003_v18, %v1882_v21  ;;  %v896_v59 = vmul.f32 %v1903_v30, %v863_v53 }
  0xa5   : > { %v637_v32 = vadd.f32 %v605_v47, %v540_v46  ;;  %v1260_v51 = vadd.f32 %v1228_v31, %v1811_v4  ;;  %v1193_v41 = vadd.f32 %v1161_v45, %v1096_v17  ;;  %v968_v62 = vmul.f32 %v1912_v37, %v2135_v15 }
  0xa6   : > { %v902_v47 = vadd.f32 %v870_v26, %v805_v29  ;;  %v515_v56 = vadd.f32 %v483_v25, %v386_v55  ;;  %v580_v58 = vmul.f32 %v2005_v36, %v1884_v22  ;;  %v1188_v3 = vmul.f32 %v1923_v44, %v1155_v20  ;;  %v936_v26 = vld [vmem:[#allocation2 + $0x78] sm:$0xff] }
  0xa7   : > { %v734_v33 = vadd.f32 %v702_v28, %v637_v32  ;;  %v2155_v28 = vld [vmem:[#allocation2 + $0x6a] sm:$0xff]  ;;  %v1296_v18 = vadd.f32 %v2088_v38, %v1260_v51  ;;  %v1229_v60 = vmul.f32 %v2054_v61, %v1193_v41  ;;  %v1065_v4 = vmul.f32 %v1921_v43, %v2145_v49  ;;  %v2186_v25 = vld [vmem:[#allocation2 + $0x7a] sm:$0xff] }
  0xa8   : > { %v1000_v2 = vadd.f32 %v968_v62, %v902_v47  ;;  %v612_v40 = vadd.f32 %v580_v58, %v515_v56  ;;  %v677_v32 = vmul.f32 %v2096_v35, %v1886_v23  ;;  %v1162_v36 = vmul.f32 %v1923_v44, %v2155_v28  ;;  %v2195_v62 = vld [vmem:[#allocation2 + $0x80] sm:$0xff] }
  0xa9   : > { %v831_v46 = vadd.f32 %v799_v24, %v734_v33  ;;  %1328 = vst.msk [vmem:[%s1742_s9 + $0x18] sm:$0xff] %vm311_vm2, %v1296_v18  ;;  %v1261_v53 = vadd.f32 %v1229_v60, %v1816_v5  ;;  %v387_v45 = vmul.f32 %v2042_v42, %v1875_v19  ;;  %v484_v34 = vmul.f32 %v2044_v0, %v1882_v21  ;;  %v2178_v33 = vld [vmem:[#allocation2 + $0x79] sm:$0xff] }
  0xaa   : > { %v1097_v24 = vadd.f32 %v1065_v4, %v1000_v2  ;;  %v709_v31 = vadd.f32 %v677_v32, %v612_v40  ;;  %v774_v17 = vmul.f32 %v2106_v54, %v1896_v27  ;;  %v581_v42 = vmul.f32 %v2067_v14, %v1884_v22  ;;  %v2204_v4 = vld [vmem:[#allocation2 + $0x81] sm:$0xff] }
  0xab   : > { %v928_v1 = vadd.f32 %v896_v59, %v831_v46  ;;  %v1297_v5 = vadd.f32 %v2088_v38, %v1261_v53  ;;  %v516_v20 = vadd.f32 %v484_v34, %v387_v45  ;;  %v969_v59 = vmul.f32 %v1912_v37, %v936_v26 }
  0xac   : > { %v1194_v55 = vadd.f32 %v1162_v36, %v1097_v24  ;;  %v806_v0 = vadd.f32 %v774_v17, %v709_v31  ;;  %v1066_v51 = vmul.f32 %v1921_v43, %v2178_v33  ;;  %v678_v14 = vmul.f32 %v2135_v15, %v1886_v23  ;;  %v2223_v31 = vld [vmem:[#allocation2 + $0x90] sm:$0xff] }
  0xad   : > { %v1026_v48 = vadd.f32 %v1936_v50, %v928_v1  ;;  %v871_v50 = vmul.f32 %v2123_v16, %v1903_v30  ;;  %1329 = vst.msk [vmem:[%s1742_s9 + $0x20] sm:$0xff] %vm311_vm2, %v1297_v5  ;;  %v613_v41 = vadd.f32 %v581_v42, %v516_v20  ;;  %v388_v56 = vmul.f32 %v2096_v35, %v1875_v19  ;;  %v2206_v1 = vld [vmem:[#allocation2 + $0x82] sm:$0xff]  ;;  %v2226_v42 = vld [vmem:[#allocation2 + $0x91] sm:$0xff] }
  0xae   : > { %v1230_v46 = vmul.f32 %v2054_v61, %v1194_v55  ;;  %v1163_v58 = vmul.f32 %v1923_v44, %v2186_v25  ;;  %v775_v60 = vmul.f32 %v2145_v49, %v1896_v27  ;;  %v872_v35 = vmul.f32 %v2155_v28, %v1903_v30 }
  0xaf   : > { %v1123_v29 = vadd.f32 %v1974_v39, %v1026_v48  ;;  %v903_v47 = vadd.f32 %v871_v50, %v806_v0  ;;  %v710_v18 = vadd.f32 %v678_v14, %v613_v41  ;;  %v970_v32 = vmul.f32 %v1912_v37, %v2195_v62  ;;  %v2236_v50 = vld [vmem:[#allocation2 + $0x92] sm:$0xff] }
  0xb0   : > { %v1262_v2 = vadd.f32 %v1230_v46, %v1821_v6  ;;  %v582_v34 = vmul.f32 %v2123_v16, %v1884_v22  ;;  %v1067_v6 = vmul.f32 %v1921_v43, %v2204_v4  ;;  %v1164_v24 = vmul.f32 %v1923_v44, %v2206_v1 }
  0xb1   : > { %v1220_v39 = vadd.f32 %v1188_v3, %v1123_v29  ;;  %v485_v3 = vmul.f32 %v2106_v54, %v1882_v21  ;;  %v1001_v40 = vadd.f32 %v969_v59, %v903_v47  ;;  %v807_v36 = vadd.f32 %v775_v60, %v710_v18 }
  0xb2   : > { %v1298_v48 = vadd.f32 %v2088_v38, %v1262_v2  ;;  %v679_v20 = vmul.f32 %v936_v26, %v1886_v23  ;;  %v389_v16 = vmul.f32 %v2135_v15, %v1875_v19  ;;  %v776_v55 = vmul.f32 %v2178_v33, %v1896_v27 }
  0xb3   : > { %v1256_v53 = vmul.f32 %v2054_v61, %v1220_v39  ;;  %v517_v45 = vadd.f32 %v485_v3, %v388_v56  ;;  %v1098_v54 = vadd.f32 %v1066_v51, %v1001_v40  ;;  %v904_v17 = vadd.f32 %v872_v35, %v807_v36  ;;  %v2256_v40 = vld [vmem:[#allocation2 + $0x98] sm:$0xff] }
  0xb4   : > { %1330 = vst.msk [vmem:[%s1742_s9 + $0x28] sm:$0xff] %vm311_vm2, %v1298_v48  ;;  %v873_v0 = vmul.f32 %v2186_v25, %v1903_v30  ;;  %v486_v59 = vmul.f32 %v2145_v49, %v1882_v21  ;;  %v971_v15 = vmul.f32 %v1912_v37, %v2223_v31  ;;  %v1068_v46 = vmul.f32 %v1921_v43, %v2226_v42  ;;  %v2258_v35 = vld [vmem:[#allocation2 + $0x99] sm:$0xff] }
  0xb5   : > { %v614_v5 = vadd.f32 %v582_v34, %v517_v45  ;;  %v1195_v29 = vadd.f32 %v1163_v58, %v1098_v54  ;;  %v2241_v51 = vadd.f32 %v1256_v53, %v2063_v57  ;;  %v1002_v41 = vadd.f32 %v970_v32, %v904_v17  ;;  %v2267_v34 = vld [vmem:[#allocation2 + $0x9a] sm:$0xff] }
  0xb6   : > { %v518_v47 = vadd.f32 %v486_v59, %v389_v16  ;;  %v583_v56 = vmul.f32 %v2155_v28, %v1884_v22  ;;  %v1165_v57 = vmul.f32 %v1923_v44, %v2236_v50  ;;  %v390_v49 = vmul.f32 %v936_v26, %v1875_v19  ;;  %v2285_v59 = vld [vmem:[#allocation2 + $0xa8] sm:$0xff] }
  0xb7   : > { %v711_v14 = vadd.f32 %v679_v20, %v614_v5  ;;  %v1231_v39 = vmul.f32 %v2054_v61, %v1195_v29  ;;  %v1099_v58 = vadd.f32 %v1067_v6, %v1002_v41  ;;  %v680_v2 = vmul.f32 %v2195_v62, %v1886_v23  ;;  %v2287_v41 = vld [vmem:[#allocation2 + $0xa9] sm:$0xff] }
  0xb8   : > { %v615_v3 = vadd.f32 %v583_v56, %v518_v47  ;;  %v487_v28 = vmul.f32 %v2178_v33, %v1882_v21  ;;  %v777_v36 = vmul.f32 %v2204_v4, %v1896_v27  ;;  %v584_v54 = vmul.f32 %v2186_v25, %v1884_v22  ;;  %v2296_v56 = vld [vmem:[#allocation2 + $0xaa] sm:$0xff] }
  0xb9   : > { %v808_v18 = vadd.f32 %v776_v55, %v711_v14  ;;  %v1263_v60 = vadd.f32 %v1231_v39, %v1826_v7  ;;  %v1196_v32 = vadd.f32 %v1164_v24, %v1099_v58  ;;  %v874_v7 = vmul.f32 %v2206_v1, %v1903_v30 }
  0xba   : > { %v712_v45 = vadd.f32 %v680_v2, %v615_v3  ;;  %v519_v48 = vadd.f32 %v487_v28, %v390_v49  ;;  %v972_v24 = vmul.f32 %v1912_v37, %v2256_v40  ;;  %v1069_v17 = vmul.f32 %v1921_v43, %v2258_v35 }
  0xbb   : > { %v905_v53 = vadd.f32 %v873_v0, %v808_v18  ;;  %v1299_v26 = vadd.f32 %v2088_v38, %v1263_v60  ;;  %v1232_v6 = vmul.f32 %v2054_v61, %v1196_v32  ;;  %v681_v16 = vmul.f32 %v2223_v31, %v1886_v23 }
  0xbc   : > { %v809_v5 = vadd.f32 %v777_v36, %v712_v45  ;;  %v616_v20 = vadd.f32 %v584_v54, %v519_v48  ;;  %v391_v29 = vmul.f32 %v2195_v62, %v1875_v19  ;;  %v1166_v0 = vmul.f32 %v1923_v44, %v2267_v34 }
  0xbd   : > { %v1003_v33 = vadd.f32 %v971_v15, %v905_v53  ;;  %1331 = vst.msk [vmem:[%s1742_s9 + $0x30] sm:$0xff] %vm311_vm2, %v1299_v26  ;;  %v1264_v25 = vadd.f32 %v1232_v6, %v1831_v8  ;;  %v488_v14 = vmul.f32 %v2204_v4, %v1882_v21  ;;  %v778_v47 = vmul.f32 %v2226_v42, %v1896_v27  ;;  %v2315_v26 = vld [vmem:[#allocation2 + $0xb1] sm:$0xff] }
  0xbe   : > { %v906_v15 = vadd.f32 %v874_v7, %v809_v5  ;;  %v713_v39 = vadd.f32 %v681_v16, %v616_v20  ;;  %v875_v8 = vmul.f32 %v2236_v50, %v1903_v30  ;;  %v585_v18 = vmul.f32 %v2206_v1, %v1884_v22  ;;  %v2313_v7 = vld [vmem:[#allocation2 + $0xb0] sm:$0xff] }
  0xbf   : > { %v1100_v55 = vadd.f32 %v1068_v46, %v1003_v33  ;;  %v1300_v62 = vadd.f32 %v2088_v38, %v1264_v25  ;;  %v520_v58 = vadd.f32 %v488_v14, %v391_v29  ;;  %v973_v4 = vmul.f32 %v1912_v37, %v2285_v59 }
  0xc0   : > { %v1004_v49 = vadd.f32 %v972_v24, %v906_v15  ;;  %v810_v60 = vadd.f32 %v778_v47, %v713_v39  ;;  %v1070_v3 = vmul.f32 %v1921_v43, %v2287_v41  ;;  %v392_v32 = vmul.f32 %v2223_v31, %v1875_v19  ;;  %v2340_v39 = vld [vmem:[#allocation2 + $0xc0] sm:$0xff] }
  0xc1   : > { %v1197_v46 = vadd.f32 %v1165_v57, %v1100_v55  ;;  %1332 = vst.msk [vmem:[%s1742_s9 + $0x38] sm:$0xff] %vm311_vm2, %v1300_v62  ;;  %v617_v28 = vadd.f32 %v585_v18, %v520_v58  ;;  %v682_v57 = vmul.f32 %v2256_v40, %v1886_v23  ;;  %v1167_v36 = vmul.f32 %v1923_v44, %v2296_v56 }
  0xc2   : > { %v1101_v1 = vadd.f32 %v1069_v17, %v1004_v49  ;;  %v907_v53 = vadd.f32 %v875_v8, %v810_v60  ;;  %v489_v45 = vmul.f32 %v2226_v42, %v1882_v21  ;;  %v779_v6 = vmul.f32 %v2258_v35, %v1896_v27  ;;  %v2324_v17 = vld [vmem:[#allocation2 + $0xb2] sm:$0xff]  ;;  %v2349_v49 = vld [vmem:[#allocation2 + $0xc1] sm:$0xff] }
  0xc3   : > { %v1233_v2 = vmul.f32 %v2054_v61, %v1197_v46  ;;  %v714_v54 = vadd.f32 %v682_v57, %v617_v28  ;;  %v876_v31 = vmul.f32 %v2267_v34, %v1903_v30  ;;  %v586_v20 = vmul.f32 %v2236_v50, %v1884_v22  ;;  %v2359_v57 = vld [vmem:[#allocation2 + $0xc2] sm:$0xff] }
  0xc4   : > { %v1198_v33 = vadd.f32 %v1166_v0, %v1101_v1  ;;  %v1005_v24 = vadd.f32 %v973_v4, %v907_v53  ;;  %v521_v5 = vadd.f32 %v489_v45, %v392_v32  ;;  %v1071_v29 = vmul.f32 %v1921_v43, %v2315_v26 }
  0xc5   : > { %v1265_v48 = vadd.f32 %v1233_v2, %v1836_v9  ;;  %v811_v16 = vadd.f32 %v779_v6, %v714_v54  ;;  %v974_v9 = vmul.f32 %v1912_v37, %v2313_v7  ;;  %v683_v14 = vmul.f32 %v2285_v59, %v1886_v23 }
  0xc6   : > { %v1234_v25 = vmul.f32 %v2054_v61, %v1198_v33  ;;  %v1102_v55 = vadd.f32 %v1070_v3, %v1005_v24  ;;  %v618_v0 = vadd.f32 %v586_v20, %v521_v5  ;;  %v1168_v50 = vmul.f32 %v1923_v44, %v2324_v17  ;;  %v2378_v20 = vld [vmem:[#allocation2 + $0xc9] sm:$0xff] }
  0xc7   : > { %v1301_v42 = vadd.f32 %v2088_v38, %v1265_v48  ;;  %v908_v15 = vadd.f32 %v876_v31, %v811_v16  ;;  %v393_v47 = vmul.f32 %v2256_v40, %v1875_v19  ;;  %v490_v8 = vmul.f32 %v2258_v35, %v1882_v21  ;;  %v2368_v48 = vld [vmem:[#allocation2 + $0xc8] sm:$0xff] }
  0xc8   : > { %v1266_v62 = vadd.f32 %v1234_v25, %v1841_v10  ;;  %v1199_v46 = vadd.f32 %v1167_v36, %v1102_v55  ;;  %v715_v58 = vadd.f32 %v683_v14, %v618_v0  ;;  %v780_v18 = vmul.f32 %v2287_v41, %v1896_v27  ;;  %v2388_v55 = vld [vmem:[#allocation2 + $0xca] sm:$0xff] }
  0xc9   : > { %1333 = vst.msk [vmem:[%s1742_s9 + $0x40] sm:$0xff] %vm311_vm2, %v1301_v42  ;;  %v1006_v60 = vadd.f32 %v974_v9, %v908_v15  ;;  %v877_v4 = vmul.f32 %v2296_v56, %v1903_v30  ;;  %v522_v3 = vadd.f32 %v490_v8, %v393_v47  ;;  %v587_v40 = vmul.f32 %v2267_v34, %v1884_v22  ;;  %v2397_v8 = vld [vmem:[#allocation2 + $0xd8] sm:$0xff] }
  0xca   : > { %v1302_v35 = vadd.f32 %v2088_v38, %v1266_v62  ;;  %v1235_v10 = vmul.f32 %v2054_v61, %v1199_v46  ;;  %v812_v2 = vadd.f32 %v780_v18, %v715_v58  ;;  %v975_v28 = vmul.f32 %v1912_v37, %v2340_v39 }
  0xcb   : > { %v1103_v32 = vadd.f32 %v1071_v29, %v1006_v60  ;;  %v1072_v1 = vmul.f32 %v1921_v43, %v2349_v49  ;;  %v619_v53 = vadd.f32 %v587_v40, %v522_v3  ;;  %v684_v36 = vmul.f32 %v2313_v7, %v1886_v23  ;;  %v2407_v3 = vld [vmem:[#allocation2 + $0xd9] sm:$0xff] }
  0xcc   : > { %1334 = vst.msk [vmem:[%s1742_s9 + $0x48] sm:$0xff] %vm311_vm2, %v1302_v35  ;;  %v1267_v34 = vadd.f32 %v1235_v10, %v1846_v11  ;;  %v909_v45 = vadd.f32 %v877_v4, %v812_v2  ;;  %v394_v54 = vmul.f32 %v2285_v59, %v1875_v19  ;;  %v491_v6 = vmul.f32 %v2287_v41, %v1882_v21 }
  0xcd   : > { %v1200_v31 = vadd.f32 %v1168_v50, %v1103_v32  ;;  %v1169_v33 = vmul.f32 %v1923_v44, %v2359_v57  ;;  %v716_v24 = vadd.f32 %v684_v36, %v619_v53  ;;  %v781_v5 = vmul.f32 %v2315_v26, %v1896_v27  ;;  %v2417_v32 = vld [vmem:[#allocation2 + $0xda] sm:$0xff] }
  0xce   : > { %v1303_v11 = vadd.f32 %v2088_v38, %v1267_v34  ;;  %v1007_v42 = vadd.f32 %v975_v28, %v909_v45  ;;  %v523_v16 = vadd.f32 %v491_v6, %v394_v54  ;;  %v588_v59 = vmul.f32 %v2296_v56, %v1884_v22  ;;  %v2426_v54 = vld [vmem:[#allocation2 + $0xe0] sm:$0xff] }
  0xcf   : > { %v1236_v9 = vmul.f32 %v2054_v61, %v1200_v31  ;;  %v813_v41 = vadd.f32 %v781_v5, %v716_v24  ;;  %v878_v29 = vmul.f32 %v2324_v17, %v1903_v30  ;;  %v976_v25 = vmul.f32 %v1912_v37, %v2368_v48 }
  0xd0   : > { %1335 = vst.msk [vmem:[%s1742_s9 + $0x50] sm:$0xff] %vm311_vm2, %v1303_v11  ;;  %v1104_v0 = vadd.f32 %v1072_v1, %v1007_v42  ;;  %v1073_v14 = vmul.f32 %v1921_v43, %v2378_v20  ;;  %v620_v15 = vadd.f32 %v588_v59, %v523_v16  ;;  %v685_v56 = vmul.f32 %v2340_v39, %v1886_v23  ;;  %v2436_v42 = vld [vmem:[#allocation2 + $0xe1] sm:$0xff] }
  0xd1   : > { %v1268_v50 = vadd.f32 %v1236_v9, %v1851_v12  ;;  %v910_v47 = vadd.f32 %v878_v29, %v813_v41  ;;  %v395_v62 = vmul.f32 %v2313_v7, %v1875_v19  ;;  %v492_v46 = vmul.f32 %v2315_v26, %v1882_v21 }
  0xd2   : > { %v1201_v58 = vadd.f32 %v1169_v33, %v1104_v0  ;;  %v1170_v18 = vmul.f32 %v1923_v44, %v2388_v55  ;;  %v717_v60 = vadd.f32 %v685_v56, %v620_v15  ;;  %v782_v4 = vmul.f32 %v2349_v49, %v1896_v27  ;;  %v2940_v56 = vld [vmem:[#allocation9_spill] sm:$0xff] }
  0xd3   : > { %v1304_v12 = vadd.f32 %v2088_v38, %v1268_v50  ;;  %v1008_v40 = vadd.f32 %v976_v25, %v910_v47  ;;  %v524_v35 = vadd.f32 %v492_v46, %v395_v62  ;;  %v589_v7 = vmul.f32 %v2324_v17, %v1884_v22  ;;  %v2446_v25 = vld [vmem:[#allocation2 + $0xe2] sm:$0xff]  ;;  %v2455_v62 = vld [vmem:[#allocation2 + $0xf0] sm:$0xff] }
  0xd4   : > { %v1237_v10 = vmul.f32 %v2054_v61, %v1201_v58  ;;  %v814_v26 = vadd.f32 %v782_v4, %v717_v60  ;;  %v879_v2 = vmul.f32 %v2359_v57, %v1903_v30  ;;  %v977_v28 = vmul.f32 %v1912_v37, %v2397_v8 }
  0xd5   : > { %1336 = vst.msk [vmem:[%s1742_s9 + $0x58] sm:$0xff] %vm311_vm2, %v1304_v12  ;;  %v1105_v1 = vadd.f32 %v1073_v14, %v1008_v40  ;;  %v1074_v53 = vmul.f32 %v1921_v43, %v2407_v3  ;;  %v621_v36 = vadd.f32 %v589_v7, %v524_v35  ;;  %v686_v17 = vmul.f32 %v2368_v48, %v1886_v23  ;;  %v2465_v40 = vld [vmem:[#allocation2 + $0xf1] sm:$0xff] }
  0xd6   : > { %v1269_v34 = vadd.f32 %v1237_v10, %v1854_v13  ;;  %v911_v45 = vadd.f32 %v879_v2, %v814_v26  ;;  %v396_v6 = vmul.f32 %v2340_v39, %v1875_v19  ;;  %v493_v31 = vmul.f32 %v2349_v49, %v1882_v21 }
  0xd7   : > { %v1202_v33 = vadd.f32 %v1170_v18, %v1105_v1  ;;  %v1171_v24 = vmul.f32 %v1923_v44, %v2417_v32  ;;  %v718_v5 = vadd.f32 %v686_v17, %v621_v36  ;;  %v783_v11 = vmul.f32 %v2378_v20, %v1896_v27  ;;  %v2475_v1 = vld [vmem:[#allocation2 + $0xf2] sm:$0xff] }
  0xd8   : > { %v1305_v13 = vadd.f32 %v2088_v38, %v1269_v34  ;;  %v1009_v16 = vadd.f32 %v977_v28, %v911_v45  ;;  %v525_v59 = vadd.f32 %v493_v31, %v396_v6  ;;  %v590_v39 = vmul.f32 %v2359_v57, %v1884_v22  ;;  %v2941_v34 = vld [vmem:[#allocation10_spill] sm:$0xff] }
  0xd9   : > { %v1238_v9 = vmul.f32 %v2054_v61, %v1202_v33  ;;  %v815_v49 = vadd.f32 %v783_v11, %v718_v5  ;;  %v880_v41 = vmul.f32 %v2388_v55, %v1903_v30  ;;  %v978_v29 = vmul.f32 %v1912_v37, %v2426_v54  ;;  %v2484_v31 = vld [vmem:[#allocation2 + $0xf8] sm:$0xff] }
  0xda   : > { %1337 = vst.msk [vmem:[%s1742_s9 + $0x60] sm:$0xff] %vm311_vm2, %v1305_v13  ;;  %v1106_v0 = vadd.f32 %v1074_v53, %v1009_v16  ;;  %v1075_v14 = vmul.f32 %v1921_v43, %v2436_v42  ;;  %v622_v15 = vadd.f32 %v590_v39, %v525_v59  ;;  %v687_v57 = vmul.f32 %v2397_v8, %v1886_v23  ;;  %v2494_v59 = vld [vmem:[#allocation2 + $0xf9] sm:$0xff] }
  0xdb   : > { %v1270_v50 = vadd.f32 %v1238_v9, %v2940_v56  ;;  %v912_v47 = vadd.f32 %v880_v41, %v815_v49  ;;  %v397_v46 = vmul.f32 %v2368_v48, %v1875_v19  ;;  %v494_v58 = vmul.f32 %v2378_v20, %v1882_v21 }
  0xdc   : > { %v1203_v18 = vadd.f32 %v1171_v24, %v1106_v0  ;;  %v1172_v60 = vmul.f32 %v1923_v44, %v2446_v25  ;;  %v719_v4 = vadd.f32 %v687_v57, %v622_v15  ;;  %v784_v12 = vmul.f32 %v2407_v3, %v1896_v27 }
  0xdd   : > { %v1306_v35 = vadd.f32 %v2088_v38, %v1270_v50  ;;  %v1010_v7 = vadd.f32 %v978_v29, %v912_v47  ;;  %v526_v10 = vadd.f32 %v494_v58, %v397_v46  ;;  %v591_v48 = vmul.f32 %v2388_v55, %v1884_v22  ;;  %v2942_v50 = vld [vmem:[#allocation11_spill] sm:$0xff]  ;;  %v2513_v58 = vld [vmem:[#allocation2 + $0x108] sm:$0xff] }
  0xde   : > { %v1239_v26 = vmul.f32 %v2054_v61, %v1203_v18  ;;  %v816_v20 = vadd.f32 %v784_v12, %v719_v4  ;;  %v881_v2 = vmul.f32 %v2417_v32, %v1903_v30  ;;  %v979_v28 = vmul.f32 %v1912_v37, %v2455_v62 }
  0xdf   : > { %1338 = vst.msk [vmem:[%s1742_s9 + $0x68] sm:$0xff] %vm311_vm2, %v1306_v35  ;;  %v1107_v53 = vadd.f32 %v1075_v14, %v1010_v7  ;;  %v1076_v36 = vmul.f32 %v1921_v43, %v2465_v40  ;;  %v623_v17 = vadd.f32 %v591_v48, %v526_v10  ;;  %v688_v55 = vmul.f32 %v2426_v54, %v1886_v23  ;;  %v2504_v14 = vld [vmem:[#allocation2 + $0xfa] sm:$0xff]  ;;  %v2523_v10 = vld [vmem:[#allocation2 + $0x109] sm:$0xff] }
  0xe0   : > { %v1271_v45 = vadd.f32 %v1239_v26, %v2941_v34  ;;  %v913_v6 = vadd.f32 %v881_v2, %v816_v20  ;;  %v398_v33 = vmul.f32 %v2397_v8, %v1875_v19  ;;  %v495_v24 = vmul.f32 %v2407_v3, %v1882_v21 }
  0xe1   : > { %v1204_v5 = vadd.f32 %v1172_v60, %v1107_v53  ;;  %v1173_v11 = vmul.f32 %v1923_v44, %v2475_v1  ;;  %v720_v13 = vadd.f32 %v688_v55, %v623_v17  ;;  %v785_v16 = vmul.f32 %v2436_v42, %v1896_v27 }
  0xe2   : > { %v1307_v39 = vadd.f32 %v2088_v38, %v1271_v45  ;;  %v1011_v9 = vadd.f32 %v979_v28, %v913_v6  ;;  %v527_v49 = vadd.f32 %v495_v24, %v398_v33  ;;  %v592_v8 = vmul.f32 %v2417_v32, %v1884_v22  ;;  %v2943_v45 = vld [vmem:[#allocation12_spill] sm:$0xff]  ;;  %v2542_v24 = vld [vmem:[#allocation2 + $0x110] sm:$0xff] }
  0xe3   : > { %v1240_v41 = vmul.f32 %v2054_v61, %v1204_v5  ;;  %v817_v3 = vadd.f32 %v785_v16, %v720_v13  ;;  %v882_v29 = vmul.f32 %v2446_v25, %v1903_v30  ;;  %v980_v0 = vmul.f32 %v1912_v37, %v2484_v31 }
  0xe4   : > { %1339 = vst.msk [vmem:[%s1742_s9 + $0x70] sm:$0xff] %vm311_vm2, %v1307_v39  ;;  %v1108_v15 = vadd.f32 %v1076_v36, %v1011_v9  ;;  %v1077_v57 = vmul.f32 %v1921_v43, %v2494_v59  ;;  %v624_v56 = vadd.f32 %v592_v8, %v527_v49  ;;  %v689_v32 = vmul.f32 %v2455_v62, %v1886_v23  ;;  %v2533_v36 = vld [vmem:[#allocation2 + $0x10a] sm:$0xff] }
  0xe5   : > { %v1272_v47 = vadd.f32 %v1240_v41, %v2942_v50  ;;  %v914_v46 = vadd.f32 %v882_v29, %v817_v3  ;;  %v399_v18 = vmul.f32 %v2426_v54, %v1875_v19  ;;  %v496_v60 = vmul.f32 %v2436_v42, %v1882_v21  ;;  %v2552_v49 = vld [vmem:[#allocation2 + $0x111] sm:$0xff] }
  0xe6   : > { %v1205_v4 = vadd.f32 %v1173_v11, %v1108_v15  ;;  %v1174_v12 = vmul.f32 %v1923_v44, %v2504_v14  ;;  %v721_v35 = vadd.f32 %v689_v32, %v624_v56  ;;  %v786_v7 = vmul.f32 %v2465_v40, %v1896_v27 }
  0xe7   : > { %v1308_v48 = vadd.f32 %v2088_v38, %v1272_v47  ;;  %v1012_v26 = vadd.f32 %v980_v0, %v914_v46  ;;  %v528_v20 = vadd.f32 %v496_v60, %v399_v18  ;;  %v593_v54 = vmul.f32 %v2446_v25, %v1884_v22  ;;  %v2944_v47 = vld [vmem:[#allocation13_spill] sm:$0xff]  ;;  %v2571_v60 = vld [vmem:[#allocation2 + $0x120] sm:$0xff] }
  0xe8   : > { %v1241_v2 = vmul.f32 %v2054_v61, %v1205_v4  ;;  %v818_v42 = vadd.f32 %v786_v7, %v721_v35  ;;  %v883_v28 = vmul.f32 %v2475_v1, %v1903_v30  ;;  %v981_v53 = vmul.f32 %v1912_v37, %v2513_v58 }
  0xe9   : > { %1340 = vst.msk [vmem:[%s1742_s9 + $0x78] sm:$0xff] %vm311_vm2, %v1308_v48  ;;  %v1109_v17 = vadd.f32 %v1077_v57, %v1012_v26  ;;  %v1078_v55 = vmul.f32 %v1921_v43, %v2523_v10  ;;  %v625_v34 = vadd.f32 %v593_v54, %v528_v20  ;;  %v690_v25 = vmul.f32 %v2484_v31, %v1886_v23  ;;  %v2562_v57 = vld [vmem:[#allocation2 + $0x112] sm:$0xff]  ;;  %v2581_v20 = vld [vmem:[#allocation2 + $0x121] sm:$0xff] }
  0xea   : > { %v1273_v6 = vadd.f32 %v1241_v2, %v2943_v45  ;;  %v915_v33 = vadd.f32 %v883_v28, %v818_v42  ;;  %v400_v5 = vmul.f32 %v2455_v62, %v1875_v19  ;;  %v497_v11 = vmul.f32 %v2465_v40, %v1882_v21 }
  0xeb   : > { %v1206_v13 = vadd.f32 %v1174_v12, %v1109_v17  ;;  %v1175_v16 = vmul.f32 %v1923_v44, %v2533_v36  ;;  %v722_v39 = vadd.f32 %v690_v25, %v625_v34  ;;  %v787_v9 = vmul.f32 %v2494_v59, %v1896_v27 }
  0xec   : > { %v1309_v8 = vadd.f32 %v2088_v38, %v1273_v6  ;;  %v1013_v41 = vadd.f32 %v981_v53, %v915_v33  ;;  %v529_v3 = vadd.f32 %v497_v11, %v400_v5  ;;  %v594_v62 = vmul.f32 %v2475_v1, %v1884_v22  ;;  %v2945_v6 = vld [vmem:[#allocation14_spill] sm:$0xff]  ;;  %v2600_v11 = vld [vmem:[#allocation2 + $0x128] sm:$0xff] }
  0xed   : > { %v1242_v29 = vmul.f32 %v2054_v61, %v1206_v13  ;;  %v819_v40 = vadd.f32 %v787_v9, %v722_v39  ;;  %v884_v0 = vmul.f32 %v2504_v14, %v1903_v30  ;;  %v982_v15 = vmul.f32 %v1912_v37, %v2542_v24 }
  0xee   : > { %1341 = vst.msk [vmem:[%s1742_s9 + $0x80] sm:$0xff] %vm311_vm2, %v1309_v8  ;;  %v1110_v56 = vadd.f32 %v1078_v55, %v1013_v41  ;;  %v1079_v32 = vmul.f32 %v1921_v43, %v2552_v49  ;;  %v626_v50 = vadd.f32 %v594_v62, %v529_v3  ;;  %v691_v1 = vmul.f32 %v2513_v58, %v1886_v23  ;;  %v2591_v55 = vld [vmem:[#allocation2 + $0x122] sm:$0xff] }
  0xef   : > { %v1274_v46 = vadd.f32 %v1242_v29, %v2944_v47  ;;  %v916_v18 = vadd.f32 %v884_v0, %v819_v40  ;;  %v401_v4 = vmul.f32 %v2484_v31, %v1875_v19  ;;  %v498_v12 = vmul.f32 %v2494_v59, %v1882_v21  ;;  %v2610_v3 = vld [vmem:[#allocation2 + $0x129] sm:$0xff] }
  0xf0   : > { %v1207_v35 = vadd.f32 %v1175_v16, %v1110_v56  ;;  %v1176_v7 = vmul.f32 %v1923_v44, %v2562_v57  ;;  %v723_v48 = vadd.f32 %v691_v1, %v626_v50  ;;  %v788_v26 = vmul.f32 %v2523_v10, %v1896_v27 }
  0xf1   : > { %v1310_v54 = vadd.f32 %v2088_v38, %v1274_v46  ;;  %v1014_v2 = vadd.f32 %v982_v15, %v916_v18  ;;  %v530_v42 = vadd.f32 %v498_v12, %v401_v4  ;;  %v595_v31 = vmul.f32 %v2504_v14, %v1884_v22  ;;  %v2946_v46 = vld [vmem:[#allocation15_spill] sm:$0xff]  ;;  %v2629_v12 = vld [vmem:[#allocation2 + $0x138] sm:$0xff] }
  0xf2   : > { %v1243_v28 = vmul.f32 %v2054_v61, %v1207_v35  ;;  %v820_v59 = vadd.f32 %v788_v26, %v723_v48  ;;  %v885_v53 = vmul.f32 %v2533_v36, %v1903_v30  ;;  %v983_v17 = vmul.f32 %v1912_v37, %v2571_v60 }
  0xf3   : > { %1342 = vst.msk [vmem:[%s1742_s9 + $0x88] sm:$0xff] %vm311_vm2, %v1310_v54  ;;  %v1111_v34 = vadd.f32 %v1079_v32, %v1014_v2  ;;  %v1080_v25 = vmul.f32 %v1921_v43, %v2581_v20  ;;  %v627_v45 = vadd.f32 %v595_v31, %v530_v42  ;;  %v692_v14 = vmul.f32 %v2542_v24, %v1886_v23  ;;  %v2620_v32 = vld [vmem:[#allocation2 + $0x12a] sm:$0xff]  ;;  %v2639_v42 = vld [vmem:[#allocation2 + $0x139] sm:$0xff] }
  0xf4   : > { %v1275_v33 = vadd.f32 %v1243_v28, %v2945_v6  ;;  %v917_v5 = vadd.f32 %v885_v53, %v820_v59  ;;  %v402_v13 = vmul.f32 %v2513_v58, %v1875_v19  ;;  %v499_v16 = vmul.f32 %v2523_v10, %v1882_v21 }
  0xf5   : > { %v1208_v39 = vadd.f32 %v1176_v7, %v1111_v34  ;;  %v1177_v9 = vmul.f32 %v1923_v44, %v2591_v55  ;;  %v724_v8 = vadd.f32 %v692_v14, %v627_v45  ;;  %v789_v41 = vmul.f32 %v2552_v49, %v1896_v27 }
  0xf6   : > { %v1311_v62 = vadd.f32 %v2088_v38, %v1275_v33  ;;  %v1015_v29 = vadd.f32 %v983_v17, %v917_v5  ;;  %v531_v40 = vadd.f32 %v499_v16, %v402_v13  ;;  %v596_v58 = vmul.f32 %v2533_v36, %v1884_v22  ;;  %v2658_v13 = vld [vmem:[#allocation2 + $0x140] sm:$0xff] }
  0xf7   : > { %v1244_v0 = vmul.f32 %v2054_v61, %v1208_v39  ;;  %v821_v10 = vadd.f32 %v789_v41, %v724_v8  ;;  %v886_v15 = vmul.f32 %v2562_v57, %v1903_v30  ;;  %v984_v56 = vmul.f32 %v1912_v37, %v2600_v11 }
  0xf8   : > { %1343 = vst.msk [vmem:[%s1742_s9 + $0x90] sm:$0xff] %vm311_vm2, %v1311_v62  ;;  %v1112_v50 = vadd.f32 %v1080_v25, %v1015_v29  ;;  %v1081_v1 = vmul.f32 %v1921_v43, %v2610_v3  ;;  %v628_v47 = vadd.f32 %v596_v58, %v531_v40  ;;  %v693_v36 = vmul.f32 %v2571_v60, %v1886_v23  ;;  %v2649_v25 = vld [vmem:[#allocation2 + $0x13a] sm:$0xff] }
  0xf9   : > { %v1276_v18 = vadd.f32 %v1244_v0, %v2946_v46  ;;  %v918_v4 = vadd.f32 %v886_v15, %v821_v10  ;;  %v403_v35 = vmul.f32 %v2542_v24, %v1875_v19  ;;  %v500_v7 = vmul.f32 %v2552_v49, %v1882_v21  ;;  %v2668_v29 = vld [vmem:[#allocation2 + $0x141] sm:$0xff]  ;;  %v2948_v46 = vld [vmem:[#allocation17_spill] sm:$0xff] }
  0xfa   : > { %v1209_v48 = vadd.f32 %v1177_v9, %v1112_v50  ;;  %v1178_v26 = vmul.f32 %v1923_v44, %v2620_v32  ;;  %v725_v54 = vadd.f32 %v693_v36, %v628_v47  ;;  %v790_v2 = vmul.f32 %v2581_v20, %v1896_v27 }
  0xfb   : > { %v1312_v31 = vadd.f32 %v2088_v38, %v1276_v18  ;;  %v1016_v28 = vadd.f32 %v984_v56, %v918_v4  ;;  %v532_v59 = vadd.f32 %v500_v7, %v403_v35  ;;  %v597_v24 = vmul.f32 %v2562_v57, %v1884_v22  ;;  %v2692_v35 = vld [vmem:[#allocation2 + $0x150] sm:$0xff] }
  0xfc   : > { %v1245_v53 = vmul.f32 %v2054_v61, %v1209_v48  ;;  %v822_v49 = vadd.f32 %v790_v2, %v725_v54  ;;  %v887_v17 = vmul.f32 %v2591_v55, %v1903_v30  ;;  %v985_v34 = vmul.f32 %v1912_v37, %v2629_v12  ;;  %v2947_v61 = vld [vmem:[#allocation16_spill] sm:$0xff] }
  0xfd   : > { %1344 = vst.msk [vmem:[%s1742_s9 + $0x98] sm:$0xff] %vm311_vm2, %v1312_v31  ;;  %v1113_v45 = vadd.f32 %v1081_v1, %v1016_v28  ;;  %v1082_v14 = vmul.f32 %v1921_v43, %v2639_v42  ;;  %v629_v6 = vadd.f32 %v597_v24, %v532_v59  ;;  %v694_v57 = vmul.f32 %v2600_v11, %v1886_v23  ;;  %v2702_v28 = vld [vmem:[#allocation2 + $0x151] sm:$0xff]  ;;  %v2707_v59 = vld [vmem:[%s2901_s3] ss:$0 sm:$0xff] }
  0xfe   : > { %v1277_v33 = vadd.f32 %v1245_v53, %v2947_v61  ;;  %v919_v5 = vadd.f32 %v887_v17, %v822_v49  ;;  %v404_v16 = vmul.f32 %v2571_v60, %v1875_v19  ;;  %v501_v39 = vmul.f32 %v2581_v20, %v1882_v21  ;;  %v2676_v20 = vld [vmem:[%s2900_s2] ss:$0 sm:$0xff] }
  0xff   : > { %v1210_v9 = vadd.f32 %v1178_v26, %v1113_v45  ;;  %v1179_v8 = vmul.f32 %v1923_v44, %v2649_v25  ;;  %v726_v41 = vadd.f32 %v694_v57, %v629_v6  ;;  %v791_v62 = vmul.f32 %v2610_v3, %v1896_v27 }
 0x100   : > { %v1313_v40 = vadd.f32 %v2088_v38, %v1277_v33  ;;  %v1017_v58 = vadd.f32 %v985_v34, %v919_v5  ;;  %v533_v0 = vadd.f32 %v501_v39, %v404_v16  ;;  %v598_v60 = vmul.f32 %v2591_v55, %v1884_v22  ;;  %v2683_v38 = vld [vmem:[#allocation2 + $0x142] sm:$0xff]  ;;  %v2949_v33 = vld [vmem:[#allocation18_spill] sm:$0xff] }
 0x101   : > { %v1246_v10 = vmul.f32 %v2676_v20, %v1210_v9  ;;  %v823_v15 = vadd.f32 %v791_v62, %v726_v41  ;;  %v888_v56 = vmul.f32 %v2620_v32, %v1903_v30  ;;  %v986_v50 = vmul.f32 %v1912_v37, %v2658_v13  ;;  %v2726_v39 = vld [vmem:[#allocation2 + $0x158] sm:$0xff] }
 0x102   : > { %1345 = vst.msk [vmem:[%s1742_s9 + $0xa0] sm:$0xff] %vm311_vm2, %v1313_v40  ;;  %v1114_v1 = vadd.f32 %v1082_v14, %v1017_v58  ;;  %v1083_v55 = vmul.f32 %v1921_v43, %v2668_v29  ;;  %v630_v47 = vadd.f32 %v598_v60, %v533_v0  ;;  %v695_v36 = vmul.f32 %v2629_v12, %v1886_v23  ;;  %v2717_v14 = vld [vmem:[#allocation2 + $0x152] sm:$0xff] }
 0x103   : > { %v1278_v18 = vadd.f32 %v1246_v10, %v2948_v46  ;;  %v920_v4 = vadd.f32 %v888_v56, %v823_v15  ;;  %v405_v7 = vmul.f32 %v2600_v11, %v1875_v19  ;;  %v502_v48 = vmul.f32 %v2610_v3, %v1882_v21  ;;  %v2736_v0 = vld [vmem:[#allocation2 + $0x159] sm:$0xff] }
 0x104   : > { %v1211_v26 = vadd.f32 %v1179_v8, %v1114_v1  ;;  %v1180_v54 = vmul.f32 %v1923_v44, %v2683_v38  ;;  %v727_v2 = vadd.f32 %v695_v36, %v630_v47  ;;  %v792_v31 = vmul.f32 %v2639_v42, %v1896_v27 }
 0x105   : > { %v1314_v11 = vadd.f32 %v2707_v59, %v1278_v18  ;;  %v1018_v24 = vadd.f32 %v986_v50, %v920_v4  ;;  %v534_v3 = vadd.f32 %v502_v48, %v405_v7  ;;  %v599_v53 = vmul.f32 %v2620_v32, %v1884_v22  ;;  %v2950_v18 = vld [vmem:[#allocation19_spill] sm:$0xff]  ;;  %v2755_v48 = vld [vmem:[#allocation2 + $0x168] sm:$0xff] }
 0x106   : > { %v1247_v49 = vmul.f32 %v2676_v20, %v1211_v26  ;;  %v824_v17 = vadd.f32 %v792_v31, %v727_v2  ;;  %v889_v34 = vmul.f32 %v2649_v25, %v1903_v30  ;;  %v987_v45 = vmul.f32 %v1912_v37, %v2692_v35 }
 0x107   : > { %1346 = vst.msk [vmem:[%s1742_s9 + $0xa8] sm:$0xff] %vm311_vm2, %v1314_v11  ;;  %v1115_v6 = vadd.f32 %v1083_v55, %v1018_v24  ;;  %v1084_v57 = vmul.f32 %v1921_v43, %v2702_v28  ;;  %v631_v61 = vadd.f32 %v599_v53, %v534_v3  ;;  %v696_v32 = vmul.f32 %v2658_v13, %v1886_v23  ;;  %v2746_v55 = vld [vmem:[#allocation2 + $0x15a] sm:$0xff]  ;;  %v2765_v3 = vld [vmem:[#allocation2 + $0x169] sm:$0xff] }
 0x108   : > { %v1279_v5 = vadd.f32 %v1247_v49, %v2949_v33  ;;  %v921_v16 = vadd.f32 %v889_v34, %v824_v17  ;;  %v406_v9 = vmul.f32 %v2629_v12, %v1875_v19  ;;  %v503_v8 = vmul.f32 %v2639_v42, %v1882_v21 }
 0x109   : > { %v1212_v41 = vadd.f32 %v1180_v54, %v1115_v6  ;;  %v1181_v62 = vmul.f32 %v1923_v44, %v2717_v14  ;;  %v728_v40 = vadd.f32 %v696_v32, %v631_v61  ;;  %v793_v58 = vmul.f32 %v2668_v29, %v1896_v27 }
 0x10a   : > { %v1315_v60 = vadd.f32 %v2707_v59, %v1279_v5  ;;  %v1019_v10 = vadd.f32 %v987_v45, %v921_v16  ;;  %v535_v15 = vadd.f32 %v503_v8, %v406_v9  ;;  %v600_v12 = vmul.f32 %v2649_v25, %v1884_v22  ;;  %v2951_v5 = vld [vmem:[#allocation20_spill] sm:$0xff]  ;;  %v957_v8 = vld [vmem:[#allocation2 + $0x170] sm:$0xff] }
 0x10b   : > { %v1248_v56 = vmul.f32 %v2676_v20, %v1212_v41  ;;  %v825_v42 = vadd.f32 %v793_v58, %v728_v40  ;;  %v890_v50 = vmul.f32 %v2683_v38, %v1903_v30  ;;  %v988_v1 = vmul.f32 %v1912_v37, %v2726_v39 }
 0x10c   : > { %1347 = vst.msk [vmem:[%s1742_s9 + $0xb0] sm:$0xff] %vm311_vm2, %v1315_v60  ;;  %v1116_v47 = vadd.f32 %v1084_v57, %v1019_v10  ;;  %v1085_v36 = vmul.f32 %v1921_v43, %v2736_v0  ;;  %v632_v46 = vadd.f32 %v600_v12, %v535_v15  ;;  %v697_v25 = vmul.f32 %v2692_v35, %v1886_v23  ;;  %v1150_v57 = vld [vmem:[#allocation2 + $0x16a] sm:$0xff] }
 0x10d   : > { %v1280_v4 = vadd.f32 %v1248_v56, %v2950_v18  ;;  %v922_v7 = vadd.f32 %v890_v50, %v825_v42  ;;  %v407_v26 = vmul.f32 %v2658_v13, %v1875_v19  ;;  %v504_v54 = vmul.f32 %v2668_v29, %v1882_v21  ;;  %v1054_v15 = vld [vmem:[#allocation2 + $0x171] sm:$0xff] }
 0x10e   : > { %v1213_v2 = vadd.f32 %v1181_v62, %v1116_v47  ;;  %v1182_v31 = vmul.f32 %v1923_v44, %v2746_v55  ;;  %v729_v11 = vadd.f32 %v697_v25, %v632_v46  ;;  %v794_v24 = vmul.f32 %v2702_v28, %v1896_v27 }
 0x10f   : > { %v1316_v53 = vadd.f32 %v2707_v59, %v1280_v4  ;;  %v1020_v49 = vadd.f32 %v988_v1, %v922_v7  ;;  %v536_v17 = vadd.f32 %v504_v54, %v407_v26  ;;  %v601_v13 = vmul.f32 %v2683_v38, %v1884_v22  ;;  %v2952_v7 = vld [vmem:[#allocation21_spill] sm:$0xff]  ;;  %v958_v54 = vld [vmem:[#allocation2 + $0x180] sm:$0xff] }
 0x110   : > { %v1249_v34 = vmul.f32 %v2676_v20, %v1213_v2  ;;  %v826_v29 = vadd.f32 %v794_v24, %v729_v11  ;;  %v891_v45 = vmul.f32 %v2717_v14, %v1903_v30  ;;  %v989_v6 = vmul.f32 %v1912_v37, %v2755_v48 }
 0x111   : > { %1348 = vst.msk [vmem:[%s1742_s9 + $0xb8] sm:$0xff] %vm311_vm2, %v1316_v53  ;;  %v1117_v61 = vadd.f32 %v1085_v36, %v1020_v49  ;;  %v1086_v32 = vmul.f32 %v1921_v43, %v2765_v3  ;;  %v633_v33 = vadd.f32 %v601_v13, %v536_v17  ;;  %v698_v38 = vmul.f32 %v2726_v39, %v1886_v23  ;;  %v1151_v36 = vld [vmem:[#allocation2 + $0x172] sm:$0xff]  ;;  %v1055_v17 = vld [vmem:[#allocation2 + $0x181] sm:$0xff] }
 0x112   : > { %v1281_v16 = vadd.f32 %v1249_v34, %v2951_v5  ;;  %v923_v9 = vadd.f32 %v891_v45, %v826_v29  ;;  %v408_v41 = vmul.f32 %v2692_v35, %v1875_v19  ;;  %v505_v62 = vmul.f32 %v2702_v28, %v1882_v21 }
 0x113   : > { %v1214_v40 = vadd.f32 %v1182_v31, %v1117_v61  ;;  %v1183_v58 = vmul.f32 %v1923_v44, %v1150_v57  ;;  %v730_v60 = vadd.f32 %v698_v38, %v633_v33  ;;  %v795_v10 = vmul.f32 %v2736_v0, %v1896_v27 }
 0x114   : > { %v1317_v12 = vadd.f32 %v2707_v59, %v1281_v16  ;;  %v1021_v56 = vadd.f32 %v989_v6, %v923_v9  ;;  %v537_v42 = vadd.f32 %v505_v62, %v408_v41  ;;  %v602_v50 = vmul.f32 %v2717_v14, %v1884_v22  ;;  %v2953_v16 = vld [vmem:[#allocation22_spill] sm:$0xff] }
 0x115   : > { %v1250_v35 = vmul.f32 %v2676_v20, %v1214_v40  ;;  %v827_v1 = vadd.f32 %v795_v10, %v730_v60  ;;  %v892_v28 = vmul.f32 %v2746_v55, %v1903_v30  ;;  %v990_v47 = vmul.f32 %v1912_v37, %v957_v8 }
 0x116   : > { %1349 = vst.msk [vmem:[%s1742_s9 + $0xc0] sm:$0xff] %vm311_vm2, %v1317_v12  ;;  %v1118_v46 = vadd.f32 %v1086_v32, %v1021_v56  ;;  %v1087_v25 = vmul.f32 %v1921_v43, %v1054_v15  ;;  %v634_v18 = vadd.f32 %v602_v50, %v537_v42  ;;  %v699_v4 = vmul.f32 %v2755_v48, %v1886_v23  ;;  %v959_v42 = vld [vmem:[#allocation2 + $0x188] sm:$0xff] }
 0x117   : > { %v1282_v14 = vadd.f32 %v1250_v35, %v2952_v7  ;;  %v924_v26 = vadd.f32 %v892_v28, %v827_v1  ;;  %v409_v2 = vmul.f32 %v2726_v39, %v1875_v19  ;;  %v506_v31 = vmul.f32 %v2736_v0, %v1882_v21 }
 0x118   : > { %v1215_v11 = vadd.f32 %v1183_v58, %v1118_v46  ;;  %v1184_v24 = vmul.f32 %v1923_v44, %v1151_v36  ;;  %v731_v53 = vadd.f32 %v699_v4, %v634_v18  ;;  %v796_v49 = vmul.f32 %v2765_v3, %v1896_v27  ;;  %v1152_v58 = vld [vmem:[#allocation2 + $0x182] sm:$0xff] }
 0x119   : > { %v1318_v13 = vadd.f32 %v2707_v59, %v1282_v14  ;;  %v1022_v34 = vadd.f32 %v990_v47, %v924_v26  ;;  %v538_v29 = vadd.f32 %v506_v31, %v409_v2  ;;  %v603_v45 = vmul.f32 %v2746_v55, %v1884_v22  ;;  %v1057_v2 = vld [vmem:[#allocation2 + $0x199] sm:$0xff] }
 0x11a   : > { %v1251_v39 = vmul.f32 %v2676_v20, %v1215_v11  ;;  %v828_v6 = vadd.f32 %v796_v49, %v731_v53  ;;  %v893_v0 = vmul.f32 %v1150_v57, %v1903_v30  ;;  %v991_v61 = vmul.f32 %v1912_v37, %v958_v54  ;;  %v1154_v49 = vld [vmem:[#allocation2 + $0x19a] sm:$0xff] }
 0x11b   : > { %1350 = vst.msk [vmem:[%s1742_s9 + $0xc8] sm:$0xff] %vm311_vm2, %v1318_v13  ;;  %v1119_v32 = vadd.f32 %v1087_v25, %v1022_v34  ;;  %v1088_v33 = vmul.f32 %v1921_v43, %v1055_v17  ;;  %v635_v38 = vadd.f32 %v603_v45, %v538_v29  ;;  %v700_v5 = vmul.f32 %v957_v8, %v1886_v23 }
 0x11c   : > { %v1283_v9 = vadd.f32 %v1251_v39, %v2953_v16  ;;  %v925_v41 = vadd.f32 %v893_v0, %v828_v6  ;;  %v410_v55 = vmul.f32 %v2755_v48, %v1875_v19  ;;  %v507_v62 = vmul.f32 %v2765_v3, %v1882_v21 }
 0x11d   : > { %v1216_v40 = vadd.f32 %v1184_v24, %v1119_v32  ;;  %v732_v60 = vadd.f32 %v700_v5, %v635_v38  ;;  %v797_v10 = vmul.f32 %v1054_v15, %v1896_v27  ;;  %v604_v12 = vmul.f32 %v1150_v57, %v1884_v22  ;;  %v1056_v15 = vld [vmem:[#allocation2 + $0x189] sm:$0xff]  ;;  %v2954_v57 = vld [vmem:[#allocation23_spill] sm:$0xff] }
 0x11e   : > { %v1319_v56 = vadd.f32 %v2707_v59, %v1283_v9  ;;  %v1023_v8 = vadd.f32 %v991_v61, %v925_v41  ;;  %v539_v50 = vadd.f32 %v507_v62, %v410_v55  ;;  %v701_v35 = vmul.f32 %v958_v54, %v1886_v23  ;;  %v960_v23 = vld [vmem:[#allocation2 + $0x198] sm:$0xff]  ;;  %v2955_v61 = vld [vmem:[#allocation24_spill] sm:$0xff] }
 0x11f   : > { %v1252_v1 = vmul.f32 %v2676_v20, %v1216_v40  ;;  %v829_v19 = vadd.f32 %v797_v10, %v732_v60  ;;  %v894_v48 = vmul.f32 %v1151_v36, %v1903_v30  ;;  %v1185_v3 = vmul.f32 %v1923_v44, %v1152_v58  ;;  %v1153_v36 = vld [vmem:[#allocation2 + $0x18a] sm:$0xff] }
 0x120   : > { %1351 = vst.msk [vmem:[%s1742_s9 + $0xd0] sm:$0xff] %vm311_vm2, %v1319_v56  ;;  %v1120_v21 = vadd.f32 %v1088_v33, %v1023_v8  ;;  %v636_v22 = vadd.f32 %v604_v12, %v539_v50  ;;  %v992_v46 = vmul.f32 %v1912_v37, %v959_v42  ;;  %v1324_v25 = vadd.f32 %v2707_v59, %v2241_v51 }
 0x121   : > { %v1284_v28 = vadd.f32 %v1252_v1, %v2954_v57  ;;  %v926_v47 = vadd.f32 %v894_v48, %v829_v19  ;;  %v798_v7 = vmul.f32 %v1055_v17, %v1896_v27  ;;  %v1089_v54 = vmul.f32 %v1921_v43, %v1056_v15 }
 0x122   : > { %v1217_v18 = vadd.f32 %v1185_v3, %v1120_v21  ;;  %v733_v4 = vadd.f32 %v701_v35, %v636_v22  ;;  %1356 = vst.msk [vmem:[%s1742_s9 + $0xf8] sm:$0xff] %vm311_vm2, %v1324_v25  ;;  %v895_v51 = vmul.f32 %v1152_v58, %v1903_v30  ;;  %v993_v24 = vmul.f32 %v1912_v37, %v960_v23 }
 0x123   : > { %v1320_v14 = vadd.f32 %v2707_v59, %v1284_v28  ;;  %v1024_v26 = vadd.f32 %v992_v46, %v926_v47  ;;  %v1186_v53 = vmul.f32 %v1923_v44, %v1153_v36  ;;  %v1090_v34 = vmul.f32 %v1921_v43, %v1057_v2 }
 0x124   : > { %v1253_v31 = vmul.f32 %v2676_v20, %v1217_v18  ;;  %v830_v11 = vadd.f32 %v798_v7, %v733_v4  ;;  %v1187_v30 = vmul.f32 %v1923_v44, %v1154_v49 }
 0x125   : > { %1352 = vst.msk [vmem:[%s1742_s9 + $0xd8] sm:$0xff] %vm311_vm2, %v1320_v14  ;;  %v1121_v27 = vadd.f32 %v1089_v54, %v1024_v26 }
 0x126   : > { %v1285_v17 = vadd.f32 %v1253_v31, %v2028_v52  ;;  %v927_v13 = vadd.f32 %v895_v51, %v830_v11 }
 0x127   : > { %v1218_v29 = vadd.f32 %v1186_v53, %v1121_v27 }
 0x128   : > { %v1321_v45 = vadd.f32 %v2707_v59, %v1285_v17  ;;  %v1025_v39 = vadd.f32 %v993_v24, %v927_v13 }
 0x129   : > { %v1254_v37 = vmul.f32 %v2676_v20, %v1218_v29 }
 0x12a   : > { %1353 = vst.msk [vmem:[%s1742_s9 + $0xe0] sm:$0xff] %vm311_vm2, %v1321_v45  ;;  %v1122_v6 = vadd.f32 %v1090_v34, %v1025_v39 }
 0x12b   : > { %v1286_v52 = vadd.f32 %v1254_v37, %v2037_v63 }
 0x12c   : > { %v1219_v43 = vadd.f32 %v1187_v30, %v1122_v6 }
 0x12d   : > { %v1322_v0 = vadd.f32 %v2707_v59, %v1286_v52 }
 0x12e   : > { %v1255_v44 = vmul.f32 %v2676_v20, %v1219_v43 }
 0x12f   : > { %1354 = vst.msk [vmem:[%s1742_s9 + $0xe8] sm:$0xff] %vm311_vm2, %v1322_v0 }
 0x130   : > { %v1287_v32 = vadd.f32 %v1255_v44, %v2955_v61 }
 0x132   : > { %v1323_v63 = vadd.f32 %v2707_v59, %v1287_v32 }
 0x134   : > { %1355 = vst.msk [vmem:[%s1742_s9 + $0xf0] sm:$0xff] %vm311_vm2, %v1323_v63 }
 0x135   : > { %1575 = shalt.err (!%p1572_p7)
}
 0x136   : > { %s1619_s7 = smov 128   ;;  %s1620_s9 = smov 8  }
 0x137   : > { %1465 = dma.vmem_to_hbm [thread:$0]  (%p1696_p11), %s1371_s19, 4096, %s1373_s13, %s1358_s20, %s1619_s7, %s1619_s7, %s1620_s9  }
 0x138 PF: > { %s1387_s8 = sand.u32 1, %s1602_s15   ;;  %p2956_p5 = scmp.ge.s32.totalorder %s1614_s18, 2 }
 0x139   : > { %s1388_s10 = scalar_lea.sflag [#allocation5], %s1387_s8 }
 0x13a   : > { %p1472_p8 = pnand %p2956_p5, %p1700_p12 }
 0x13c   : > { %p1473_p10 = pneg %p1472_p8 }
 0x13e   : > { %1597 = dma.done.wait (%p1473_p10), %s1388_s10, 4096  }
 0x13f   : > { %1599 = vsyncadd (%p1473_p10), %s1388_s10, 4294963200  ;;  %p17_p2 = scmp.ge.s32.totalorder %s1671_s21, 4   ;;  %s2957_s15 = smov %s1606_s16 }
 0x140   : > { %s2958_s16 = smov %s1610_s17  ;;  %s2959_s17 = smov %s1683_s24 }
 0x141   : > { %s2960_s18 = smov %s1671_s21  ;;  %19 = sbr.rel (!%p17_p2) target bundleno = 5 (0x5), region = 87 }
 0x146   :  { %1394 = vsyncpa [#allocation4], 1 }
 0x147   :  { %1396 = vsyncpa [#allocation4 + $0x1], 1 }
 0x148   :  { %1397 = vsyncpa [#allocation5], 1 }
 0x149   :  { %1399 = vsyncpa [#allocation5 + $0x1], 1 }

</bundles_post_ra>
